<compile_context>
chip_gen: v7x
topology: tpu7x:2x2x1
jax: 0.10.0
libtpu: 0.0.40
codegen_flags: <defaults>
</compile_context>

<pallas_src>
import functools

import jax
import jax.numpy as jnp
from jax.experimental import pallas as pl
from jax.experimental.pallas import tpu as pltpu


# --------------------------------------------------------------------------- #
# Kernel
# --------------------------------------------------------------------------- #
def cnn1d_kernel(x_ref, w1_ref, b1_ref, w2_ref, b2_ref, fcw_ref, fcb_ref, o_ref,
                 *, seq_len):
    M, _ = x_ref.shape                       # M = TB * L flattened rows
    L = seq_len
    TB = M // L
    cdt = w1_ref.dtype                       # MXU operand dtype (bf16 default)

    # Cast to the compute dtype BEFORE any roll / select so all data movement
    # in the conv tap construction happens at half width.
    x = x_ref[...].astype(cdt)               # (M, F)

    # Sequence-boundary masks on the flattened slab; computed once, reused by
    # both conv layers (t == 0 / t == L-1 within each of the TB sequences).
    row = jax.lax.broadcasted_iota(jnp.int32, (M, 1), 0)
    pos = row % L
    is_first = pos == 0
    is_last = pos == (L - 1)

    def conv3(h, w_ref, b_ref):
        """Conv1d(kernel=3, padding=1) on a flattened (M, Cin) slab.

        w_ref: (3, Cin, Cout) tap-major (tap 0 multiplies h[t-1], tap 1 h[t],
               tap 2 h[t+1]).  Three accumulated MXU dots -> no lane concat.
        b_ref: (1, Cout) float32.  Returns (M, Cout) float32 (no activation).
        """
        h_m1 = jnp.where(is_first, 0.0, pltpu.roll(h, shift=1, axis=0))      # h[t-1]
        h_p1 = jnp.where(is_last, 0.0, pltpu.roll(h, shift=M - 1, axis=0))   # h[t+1]
        z = jnp.dot(h_m1, w_ref[0], preferred_element_type=jnp.float32)
        z = z + jnp.dot(h, w_ref[1], preferred_element_type=jnp.float32)
        z = z + jnp.dot(h_p1, w_ref[2], preferred_element_type=jnp.float32)
        return z + b_ref[...]

    h1 = jnp.maximum(conv3(x, w1_ref, b1_ref), 0.0).astype(cdt)   # (M, 64)  cdt
    h2 = jnp.maximum(conv3(h1, w2_ref, b2_ref), 0.0)              # (M, 128) f32

    # AdaptiveMaxPool1d(1): per-sequence max over the time axis.
    pooled = jnp.max(h2.reshape(TB, L, h2.shape[-1]), axis=1)     # (TB, 128) f32

    out = jnp.dot(pooled.astype(cdt), fcw_ref[...],
                  preferred_element_type=jnp.float32) + fcb_ref[...]   # (TB, NCp)
    o_ref[...] = out.astype(o_ref.dtype)


# --------------------------------------------------------------------------- #
# Wrapper
# --------------------------------------------------------------------------- #
def _cdiv(a, b):
    return (a + b - 1) // b


def _round_up(a, b):
    return _cdiv(a, b) * b


def _tpu_generation():
    try:
        kind = jax.devices()[0].device_kind.lower()
    except Exception:
        kind = ""
    if "v7" in kind:
        return "v7x"
    if "v6" in kind:
        return "v6e"
    if "v5" in kind:
        return "v5e"
    return "other"


def _select_block_batch(B, L, num_cores, *, target_rows=2048, max_rows=4096):
    """Batch tile (multiple of 8): ~target_rows flattened rows per grid step.

    Single-TC chips (v5e/v6e) prefer one big step when the whole padded batch
    fits the row budget; v7x keeps an even number of grid steps >= 2 so both
    TensorCores get work.  Tile is rebalanced to minimise batch padding.
    """
    # TODO(synk): for extremely long sequences (L > max_rows) a single-sequence
    # tile can still exceed the row budget; time-axis tiling would be needed.
    B8 = _round_up(B, 8)
    row_cap_tb = max(8, ((max_rows // max(L, 1)) // 8) * 8)
    tgt_tb = max(8, ((target_rows // max(L, 1)) // 8) * 8)

    if num_cores <= 1:
        if B8 <= row_cap_tb:
            return B8                                   # one full-batch step
        steps = _cdiv(B8, min(tgt_tb, row_cap_tb))
        return min(row_cap_tb, _round_up(_cdiv(B8, steps), 8))

    # v7x: even number of grid steps (>= 2) when the batch is big enough.
    if B8 < 16:
        return B8
    tb = min(row_cap_tb, tgt_tb, B8)
    steps = _cdiv(B8, tb)
    steps = max(2, steps + (steps % 2))
    return min(row_cap_tb, max(8, _round_up(_cdiv(B8, steps), 8)))


def cnn1d_forward(x, w1, b1, w2, b2, fc_w, fc_b, *,
                  block_batch=None, compute_dtype=jnp.bfloat16):
    """x: (B, L, F).  w1: (3, F, 64), b1: (1, 64), w2: (3, 64, 128), b2: (1, 128),
    fc_w: (128, NC), fc_b: (1, NC).  Returns (B, NC) float32."""
    B, L, F = x.shape
    C1 = w1.shape[2]
    C2 = w2.shape[2]
    NC = fc_w.shape[1]
    NCp = _round_up(NC, 128)                 # lane-dense (unmasked) output stores

    gen = _tpu_generation()
    num_cores = 2 if gen == "v7x" else 1
    # Per-step footprint is only a few MiB, but set the scoped-VMEM limit
    # explicitly (generation aware) so larger tiles never silently fall back.
    vmem_limit = (64 << 20) if gen in ("v5e", "v6e") else (32 << 20)

    # --- batch-tile selection -------------------------------------------------
    if block_batch is None:
        tb = _select_block_batch(B, L, num_cores)
    else:
        tb = _round_up(max(int(block_batch), 1), 8)     # always sublane-aligned
    Bp = _cdiv(B, tb) * tb
    if Bp != B:                              # pad batch; padded rows sliced off below
        x = jnp.pad(x, ((0, Bp - B), (0, 0), (0, 0)))
    x2 = x.reshape(Bp * L, F)                # contiguous (batch*time, feature) slab
    grid = (Bp // tb,)

    # --- weight prep: tap-major conv weights, lane-padded FC -------------------
    w1t = w1.astype(compute_dtype)                       # (3, F, 64)
    w2t = w2.astype(compute_dtype)                       # (3, 64, 128)
    fcw = jnp.zeros((C2, NCp), compute_dtype).at[:, :NC].set(fc_w.astype(compute_dtype))
    fcb = jnp.zeros((1, NCp), jnp.float32).at[:, :NC].set(fc_b.astype(jnp.float32))
    b1f = b1.astype(jnp.float32)
    b2f = b2.astype(jnp.float32)

    itemsize = jnp.dtype(compute_dtype).itemsize
    cost = pl.CostEstimate(
        flops=2 * Bp * L * 3 * (F * C1 + C1 * C2) + 2 * Bp * C2 * NCp,
        transcendentals=0,
        bytes_accessed=int(x2.size * x2.dtype.itemsize
                           + (w1t.size + w2t.size + fcw.size) * itemsize
                           + (b1f.size + b2f.size + fcb.size) * 4
                           + Bp * NCp * 4),
    )

    full = lambda a: pl.BlockSpec(a.shape, lambda b: (0,) * a.ndim)
    kernel = functools.partial(cnn1d_kernel, seq_len=L)
    out = pl.pallas_call(
        kernel,
        out_shape=jax.ShapeDtypeStruct((Bp, NCp), jnp.float32),
        grid=grid,
        in_specs=[
            pl.BlockSpec((tb * L, F), lambda b: (b, 0)),   # tile of tb sequences
            full(w1t), full(b1f), full(w2t), full(b2f), full(fcw), full(fcb),
        ],
        out_specs=pl.BlockSpec((tb, NCp), lambda b: (b, 0)),
        compiler_params=pltpu.CompilerParams(
            dimension_semantics=("parallel",),
            vmem_limit_bytes=vmem_limit),
        cost_estimate=cost,
    )(x2, w1t, b1f, w2t, b2f, fcw, fcb)
    return out[:B, :NC]


# --------------------------------------------------------------------------- #
# Pure-JAX reference (mirrors the PyTorch module, f32)
# --------------------------------------------------------------------------- #
def ref_forward(x, w1, b1, w2, b2, fc_w, fc_b):
    xt = jnp.transpose(x, (0, 2, 1))                       # (B, F, L) == x.permute(0,2,1)
    dn = ("NCH", "OIH", "NCH")
    W1 = jnp.transpose(w1, (2, 1, 0))                      # (64, F, 3) torch layout
    y = jax.lax.conv_general_dilated(xt, W1, (1,), [(1, 1)], dimension_numbers=dn)
    y = jnp.maximum(y + b1[0][None, :, None], 0.0)
    W2 = jnp.transpose(w2, (2, 1, 0))                      # (128, 64, 3)
    y = jax.lax.conv_general_dilated(y, W2, (1,), [(1, 1)], dimension_numbers=dn)
    y = jnp.maximum(y + b2[0][None, :, None], 0.0)
    pooled = jnp.max(y, axis=-1)                           # (B, 128)
    return pooled @ fc_w + fc_b[0]


if __name__ == "__main__":
    # Small shapes consistent with the module: num_features=9, num_classes=2.
    # B=10 exercises batch padding (rounded to a multiple of 8).
    B, L, F = 10, 16, 9
    C1, C2, NC = 64, 128, 2

    key = jax.random.PRNGKey(0)
    ks = jax.random.split(key, 7)

    x = jax.random.normal(ks[0], (B, L, F), dtype=jnp.float32)
    # Conv weights stored tap-major (K, Cin, Cout) with w[k][ci, co] == W_torch[co, ci, k];
    # biases stored as (1, Cout).
    w1 = 0.1 * jax.random.normal(ks[1], (3, F, C1), dtype=jnp.float32)
    b1 = 0.1 * jax.random.normal(ks[2], (1, C1), dtype=jnp.float32)
    w2 = 0.1 * jax.random.normal(ks[3], (3, C1, C2), dtype=jnp.float32)
    b2 = 0.1 * jax.random.normal(ks[4], (1, C2), dtype=jnp.float32)
    fc_w = 0.1 * jax.random.normal(ks[5], (C2, NC), dtype=jnp.float32)
    fc_b = 0.1 * jax.random.normal(ks[6], (1, NC), dtype=jnp.float32)

    ref = ref_forward(x, w1, b1, w2, b2, fc_w, fc_b)

    # f32 MXU-operand path, auto tile selection: tight check against reference.
    out_f32 = jax.block_until_ready(
        cnn1d_forward(x, w1, b1, w2, b2, fc_w, fc_b, compute_dtype=jnp.float32))
    assert out_f32.shape == (B, NC), out_f32.shape
    assert jnp.allclose(out_f32, ref, atol=1e-3, rtol=1e-3), (out_f32, ref)

    # Explicit small tile: exercises the padded multi-step grid path.
    out_ms = jax.block_until_ready(
        cnn1d_forward(x, w1, b1, w2, b2, fc_w, fc_b, block_batch=8,
                      compute_dtype=jnp.float32))
    assert jnp.allclose(out_ms, ref, atol=1e-3, rtol=1e-3), (out_ms, ref)

    # Production bf16 MXU-operand path (f32 accumulation); tolerance loosened
    # only for bf16 operand rounding.
    out = jax.block_until_ready(cnn1d_forward(x, w1, b1, w2, b2, fc_w, fc_b))
    assert out.shape == (B, NC), out.shape
    assert jnp.allclose(out, ref, atol=5e-2, rtol=5e-2), (out, ref)

    print("KERNEL_OK")
</pallas_src>

<mosaic_0001>
module attributes {stable_mosaic.version = 11 : i64} {
  func.func @cnn1d_kernel(%arg0: i32, %arg1: memref<256x9xf32, #tpu.memory_space<vmem>>, %arg2: memref<3x9x64xf32, #tpu.memory_space<vmem>>, %arg3: memref<1x64xf32, #tpu.memory_space<vmem>>, %arg4: memref<3x64x128xf32, #tpu.memory_space<vmem>>, %arg5: memref<1x128xf32, #tpu.memory_space<vmem>>, %arg6: memref<128x128xf32, #tpu.memory_space<vmem>>, %arg7: memref<1x128xf32, #tpu.memory_space<vmem>>, %arg8: memref<16x128xf32, #tpu.memory_space<vmem>>) attributes {dimension_semantics = [#tpu.dimension_semantics<parallel>], iteration_bounds = array<i64: 1>, scalar_prefetch = 0 : i64, scratch_operands = 0 : i64, tpu.core_type = #tpu.core_type<tc>, window_params = [{transform_indices = @transform_0, window_bounds = array<i64: 256, 9>}, {pipeline_mode = #tpu.pipeline_mode<synchronous>, transform_indices = @transform_1, window_bounds = array<i64: 3, 9, 64>}, {pipeline_mode = #tpu.pipeline_mode<synchronous>, transform_indices = @transform_2, window_bounds = array<i64: 1, 64>}, {pipeline_mode = #tpu.pipeline_mode<synchronous>, transform_indices = @transform_3, window_bounds = array<i64: 3, 64, 128>}, {pipeline_mode = #tpu.pipeline_mode<synchronous>, transform_indices = @transform_4, window_bounds = array<i64: 1, 128>}, {pipeline_mode = #tpu.pipeline_mode<synchronous>, transform_indices = @transform_5, window_bounds = array<i64: 128, 128>}, {pipeline_mode = #tpu.pipeline_mode<synchronous>, transform_indices = @transform_6, window_bounds = array<i64: 1, 128>}, {transform_indices = @transform_7, window_bounds = array<i64: 16, 128>}]} {
    %c0 = arith.constant 0 : index
    %c0_0 = arith.constant 0 : index
    %0 = vector.load %arg1[%c0, %c0_0] : memref<256x9xf32, #tpu.memory_space<vmem>>, vector<256x9xf32>
    %1 = tpu.iota {dimensions = array<i32: 0>} : vector<256x1xi32>
    %c16_i32 = arith.constant 16 : i32
    %c0_i32 = arith.constant 0 : i32
    %2 = arith.cmpi eq, %c16_i32, %c0_i32 : i32
    %c1_i32 = arith.constant 1 : i32
    %3 = arith.select %2, %c1_i32, %c16_i32 : i32
    %4 = vector.broadcast %3 : i32 to vector<256x1xi32>
    %5 = arith.remsi %1, %4 : vector<256x1xi32>
    %c0_i32_1 = arith.constant 0 : i32
    %6 = vector.broadcast %c0_i32_1 : i32 to vector<256x1xi32>
    %7 = arith.cmpi ne, %5, %6 : vector<256x1xi32>
    %c0_i32_2 = arith.constant 0 : i32
    %8 = vector.broadcast %c0_i32_2 : i32 to vector<256x1xi32>
    %9 = arith.cmpi slt, %5, %8 : vector<256x1xi32>
    %c0_i32_3 = arith.constant 0 : i32
    %10 = arith.cmpi slt, %3, %c0_i32_3 : i32
    %11 = vector.broadcast %10 : i1 to vector<256x1xi1>
    %12 = vector.broadcast %11 : vector<256x1xi1> to vector<256x1xi1>
    %13 = arith.xori %9, %12 : vector<256x1xi1>
    %14 = arith.andi %13, %7 : vector<256x1xi1>
    %15 = vector.broadcast %3 : i32 to vector<256x1xi32>
    %16 = arith.addi %5, %15 : vector<256x1xi32>
    %17 = arith.select %14, %16, %5 : vector<256x1xi1>, vector<256x1xi32>
    %c0_i32_4 = arith.constant 0 : i32
    %18 = vector.broadcast %c0_i32_4 : i32 to vector<256x1xi32>
    %19 = arith.cmpi eq, %17, %18 : vector<256x1xi32>
    %c15_i32 = arith.constant 15 : i32
    %20 = vector.broadcast %c15_i32 : i32 to vector<256x1xi32>
    %21 = arith.cmpi eq, %17, %20 : vector<256x1xi32>
    %c1_i32_5 = arith.constant 1 : i32
    %22 = tpu.dynamic_rotate %0 by %c1_i32_5 dim 0 : vector<256x9xf32>, i32 -> vector<256x9xf32>
    %cst = arith.constant 0.000000e+00 : f32
    %23 = vector.shape_cast %19 : vector<256x1xi1> to vector<256x1xi1>
    %24 = vector.broadcast %23 : vector<256x1xi1> to vector<256x9xi1>
    %25 = vector.broadcast %cst : f32 to vector<256x9xf32>
    %26 = arith.select %24, %25, %22 : vector<256x9xi1>, vector<256x9xf32>
    %c255_i32 = arith.constant 255 : i32
    %27 = tpu.dynamic_rotate %0 by %c255_i32 dim 0 : vector<256x9xf32>, i32 -> vector<256x9xf32>
    %cst_6 = arith.constant 0.000000e+00 : f32
    %28 = vector.shape_cast %21 : vector<256x1xi1> to vector<256x1xi1>
    %29 = vector.broadcast %28 : vector<256x1xi1> to vector<256x9xi1>
    %30 = vector.broadcast %cst_6 : f32 to vector<256x9xf32>
    %31 = arith.select %29, %30, %27 : vector<256x9xi1>, vector<256x9xf32>
    %c0_7 = arith.constant 0 : index
    %c0_8 = arith.constant 0 : index
    %c0_9 = arith.constant 0 : index
    %32 = vector.load %arg2[%c0_7, %c0_8, %c0_9] : memref<3x9x64xf32, #tpu.memory_space<vmem>>, vector<1x9x64xf32>
    %33 = vector.shape_cast %32 : vector<1x9x64xf32> to vector<9x64xf32>
    %cst_10 = arith.constant dense<0.000000e+00> : vector<256x64xf32>
    %34 = tpu.matmul %26, %33, %cst_10 {dimension_numbers = #tpu.dot_dimension_numbers<[1], [0], [0], [1], [0, 0, 1, 1], [], []>} : vector<256x9xf32>, vector<9x64xf32>, vector<256x64xf32> -> vector<256x64xf32>
    %c1 = arith.constant 1 : index
    %c0_11 = arith.constant 0 : index
    %c0_12 = arith.constant 0 : index
    %35 = vector.load %arg2[%c1, %c0_11, %c0_12] : memref<3x9x64xf32, #tpu.memory_space<vmem>>, vector<1x9x64xf32>
    %36 = vector.shape_cast %35 : vector<1x9x64xf32> to vector<9x64xf32>
    %cst_13 = arith.constant dense<0.000000e+00> : vector<256x64xf32>
    %37 = tpu.matmul %0, %36, %cst_13 {dimension_numbers = #tpu.dot_dimension_numbers<[1], [0], [0], [1], [0, 0, 1, 1], [], []>} : vector<256x9xf32>, vector<9x64xf32>, vector<256x64xf32> -> vector<256x64xf32>
    %38 = arith.addf %34, %37 : vector<256x64xf32>
    %c2 = arith.constant 2 : index
    %c0_14 = arith.constant 0 : index
    %c0_15 = arith.constant 0 : index
    %39 = vector.load %arg2[%c2, %c0_14, %c0_15] : memref<3x9x64xf32, #tpu.memory_space<vmem>>, vector<1x9x64xf32>
    %40 = vector.shape_cast %39 : vector<1x9x64xf32> to vector<9x64xf32>
    %cst_16 = arith.constant dense<0.000000e+00> : vector<256x64xf32>
    %41 = tpu.matmul %31, %40, %cst_16 {dimension_numbers = #tpu.dot_dimension_numbers<[1], [0], [0], [1], [0, 0, 1, 1], [], []>} : vector<256x9xf32>, vector<9x64xf32>, vector<256x64xf32> -> vector<256x64xf32>
    %42 = arith.addf %38, %41 : vector<256x64xf32>
    %c0_17 = arith.constant 0 : index
    %c0_18 = arith.constant 0 : index
    %43 = vector.load %arg3[%c0_17, %c0_18] : memref<1x64xf32, #tpu.memory_space<vmem>>, vector<1x64xf32>
    %44 = vector.broadcast %43 : vector<1x64xf32> to vector<256x64xf32>
    %45 = arith.addf %42, %44 : vector<256x64xf32>
    %cst_19 = arith.constant 0.000000e+00 : f32
    %46 = vector.broadcast %cst_19 : f32 to vector<256x64xf32>
    %47 = arith.maximumf %45, %46 : vector<256x64xf32>
    %c1_i32_20 = arith.constant 1 : i32
    %48 = tpu.dynamic_rotate %47 by %c1_i32_20 dim 0 : vector<256x64xf32>, i32 -> vector<256x64xf32>
    %cst_21 = arith.constant 0.000000e+00 : f32
    %49 = vector.shape_cast %19 : vector<256x1xi1> to vector<256x1xi1>
    %50 = vector.broadcast %49 : vector<256x1xi1> to vector<256x64xi1>
    %51 = vector.broadcast %cst_21 : f32 to vector<256x64xf32>
    %52 = arith.select %50, %51, %48 : vector<256x64xi1>, vector<256x64xf32>
    %c255_i32_22 = arith.constant 255 : i32
    %53 = tpu.dynamic_rotate %47 by %c255_i32_22 dim 0 : vector<256x64xf32>, i32 -> vector<256x64xf32>
    %cst_23 = arith.constant 0.000000e+00 : f32
    %54 = vector.shape_cast %21 : vector<256x1xi1> to vector<256x1xi1>
    %55 = vector.broadcast %54 : vector<256x1xi1> to vector<256x64xi1>
    %56 = vector.broadcast %cst_23 : f32 to vector<256x64xf32>
    %57 = arith.select %55, %56, %53 : vector<256x64xi1>, vector<256x64xf32>
    %c0_24 = arith.constant 0 : index
    %c0_25 = arith.constant 0 : index
    %c0_26 = arith.constant 0 : index
    %58 = vector.load %arg4[%c0_24, %c0_25, %c0_26] : memref<3x64x128xf32, #tpu.memory_space<vmem>>, vector<1x64x128xf32>
    %59 = vector.shape_cast %58 : vector<1x64x128xf32> to vector<64x128xf32>
    %cst_27 = arith.constant dense<0.000000e+00> : vector<256x128xf32>
    %60 = tpu.matmul %52, %59, %cst_27 {dimension_numbers = #tpu.dot_dimension_numbers<[1], [0], [0], [1], [0, 0, 1, 1], [], []>} : vector<256x64xf32>, vector<64x128xf32>, vector<256x128xf32> -> vector<256x128xf32>
    %c1_28 = arith.constant 1 : index
    %c0_29 = arith.constant 0 : index
    %c0_30 = arith.constant 0 : index
    %61 = vector.load %arg4[%c1_28, %c0_29, %c0_30] : memref<3x64x128xf32, #tpu.memory_space<vmem>>, vector<1x64x128xf32>
    %62 = vector.shape_cast %61 : vector<1x64x128xf32> to vector<64x128xf32>
    %cst_31 = arith.constant dense<0.000000e+00> : vector<256x128xf32>
    %63 = tpu.matmul %47, %62, %cst_31 {dimension_numbers = #tpu.dot_dimension_numbers<[1], [0], [0], [1], [0, 0, 1, 1], [], []>} : vector<256x64xf32>, vector<64x128xf32>, vector<256x128xf32> -> vector<256x128xf32>
    %64 = arith.addf %60, %63 : vector<256x128xf32>
    %c2_32 = arith.constant 2 : index
    %c0_33 = arith.constant 0 : index
    %c0_34 = arith.constant 0 : index
    %65 = vector.load %arg4[%c2_32, %c0_33, %c0_34] : memref<3x64x128xf32, #tpu.memory_space<vmem>>, vector<1x64x128xf32>
    %66 = vector.shape_cast %65 : vector<1x64x128xf32> to vector<64x128xf32>
    %cst_35 = arith.constant dense<0.000000e+00> : vector<256x128xf32>
    %67 = tpu.matmul %57, %66, %cst_35 {dimension_numbers = #tpu.dot_dimension_numbers<[1], [0], [0], [1], [0, 0, 1, 1], [], []>} : vector<256x64xf32>, vector<64x128xf32>, vector<256x128xf32> -> vector<256x128xf32>
    %68 = arith.addf %64, %67 : vector<256x128xf32>
    %c0_36 = arith.constant 0 : index
    %c0_37 = arith.constant 0 : index
    %69 = vector.load %arg5[%c0_36, %c0_37] : memref<1x128xf32, #tpu.memory_space<vmem>>, vector<1x128xf32>
    %70 = vector.broadcast %69 : vector<1x128xf32> to vector<256x128xf32>
    %71 = arith.addf %68, %70 : vector<256x128xf32>
    %cst_38 = arith.constant 0.000000e+00 : f32
    %72 = vector.broadcast %cst_38 : f32 to vector<256x128xf32>
    %73 = arith.maximumf %71, %72 : vector<256x128xf32>
    %74 = vector.shape_cast %73 : vector<256x128xf32> to vector<16x16x128xf32>
    %cst_39 = arith.constant dense<0xFF800000> : vector<16x128xf32>
    %75 = vector.multi_reduction <maximumf>, %74, %cst_39 [1] : vector<16x16x128xf32> to vector<16x128xf32>
    %c0_40 = arith.constant 0 : index
    %c0_41 = arith.constant 0 : index
    %76 = vector.load %arg6[%c0_40, %c0_41] : memref<128x128xf32, #tpu.memory_space<vmem>>, vector<128x128xf32>
    %cst_42 = arith.constant dense<0.000000e+00> : vector<16x128xf32>
    %77 = tpu.matmul %75, %76, %cst_42 {dimension_numbers = #tpu.dot_dimension_numbers<[1], [0], [0], [1], [0, 0, 1, 1], [], []>} : vector<16x128xf32>, vector<128x128xf32>, vector<16x128xf32> -> vector<16x128xf32>
    %c0_43 = arith.constant 0 : index
    %c0_44 = arith.constant 0 : index
    %78 = vector.load %arg7[%c0_43, %c0_44] : memref<1x128xf32, #tpu.memory_space<vmem>>, vector<1x128xf32>
    %79 = vector.broadcast %78 : vector<1x128xf32> to vector<16x128xf32>
    %80 = arith.addf %77, %79 : vector<16x128xf32>
    %c0_45 = arith.constant 0 : index
    %c0_46 = arith.constant 0 : index
    %81 = vector.load %arg8[%c0_45, %c0_46] : memref<16x128xf32, #tpu.memory_space<vmem>>, vector<16x128xf32>
    tpu.vector_store %arg8[%c0_45, %c0_46], %80 {strides = array<i32>} : memref<16x128xf32, #tpu.memory_space<vmem>>, vector<16x128xf32>,
    return
  }
  func.func @transform_0(%arg0: i32) -> (i32, i32) {
    %c0_i32 = arith.constant 0 : i32
    %c0_i32_0 = arith.constant 0 : i32
    return %arg0, %c0_i32 : i32, i32
  }
  func.func @transform_1(%arg0: i32) -> (i32, i32, i32) {
    %c0_i32 = arith.constant 0 : i32
    %c0_i32_0 = arith.constant 0 : i32
    %c0_i32_1 = arith.constant 0 : i32
    %c0_i32_2 = arith.constant 0 : i32
    return %c0_i32, %c0_i32_0, %c0_i32_1 : i32, i32, i32
  }
  func.func @transform_2(%arg0: i32) -> (i32, i32) {
    %c0_i32 = arith.constant 0 : i32
    %c0_i32_0 = arith.constant 0 : i32
    %c0_i32_1 = arith.constant 0 : i32
    return %c0_i32, %c0_i32_0 : i32, i32
  }
  func.func @transform_3(%arg0: i32) -> (i32, i32, i32) {
    %c0_i32 = arith.constant 0 : i32
    %c0_i32_0 = arith.constant 0 : i32
    %c0_i32_1 = arith.constant 0 : i32
    %c0_i32_2 = arith.constant 0 : i32
    return %c0_i32, %c0_i32_0, %c0_i32_1 : i32, i32, i32
  }
  func.func @transform_4(%arg0: i32) -> (i32, i32) {
    %c0_i32 = arith.constant 0 : i32
    %c0_i32_0 = arith.constant 0 : i32
    %c0_i32_1 = arith.constant 0 : i32
    return %c0_i32, %c0_i32_0 : i32, i32
  }
  func.func @transform_5(%arg0: i32) -> (i32, i32) {
    %c0_i32 = arith.constant 0 : i32
    %c0_i32_0 = arith.constant 0 : i32
    %c0_i32_1 = arith.constant 0 : i32
    return %c0_i32, %c0_i32_0 : i32, i32
  }
  func.func @transform_6(%arg0: i32) -> (i32, i32) {
    %c0_i32 = arith.constant 0 : i32
    %c0_i32_0 = arith.constant 0 : i32
    %c0_i32_1 = arith.constant 0 : i32
    return %c0_i32, %c0_i32_0 : i32, i32
  }
  func.func @transform_7(%arg0: i32) -> (i32, i32) {
    %c0_i32 = arith.constant 0 : i32
    %c0_i32_0 = arith.constant 0 : i32
    return %arg0, %c0_i32 : i32, i32
  }
}

</mosaic_0001>

<bundles_post_ra>
// kernel: tpu_custom_call.1
= control target key start
LH: loop header
LB: loop body
LE: loop exit
PB: predicated region body
PF: predicated region fallthrough
CT: control target
= control target key end

     0   :  { %vm964_vm0 = vcmask 1040384   ;;  %vm4594_vm1 = vmmov 1   ;;  %vm867_vm3 = vcmask 72704   ;;  %s6205_s0 = inlined_call_operand.vmem [shape: f32[256,9], index: 0, kind: input, shape index: {}]   ;;  %s6206_s1 = inlined_call_operand.vmem [shape: f32[3,9,64], index: 1, kind: input, shape index: {}]   ;;  %s6207_s2 = inlined_call_operand.vmem [shape: f32[1,64], index: 2, kind: input, shape index: {}]   ;;  %s6208_s3 = inlined_call_operand.vmem [shape: f32[3,64,128], index: 3, kind: input, shape index: {}]   ;;  %s6209_s4 = inlined_call_operand.vmem [shape: f32[1,128], index: 4, kind: input, shape index: {}]   ;;  %s6210_s5 = inlined_call_operand.vmem [shape: f32[128,128], index: 5, kind: input, shape index: {}]   ;;  %s6211_s6 = inlined_call_operand.vmem [shape: f32[1,128], index: 6, kind: input, shape index: {}]   ;;  %s6212_s7 = inlined_call_operand.hbm [shape: f32[16,128], index: 7, kind: output, shape index: {}]  }
   0x1   :  { %v3499_v0 = vld [vmem:[%s6206_s1 + $0x10] sm:$0xff]  ;;  %v3500_v1 = vld [vmem:[%s6206_s1 + $0x18] sm:$0x1]  ;;  %v4647_v2 = vld [vmem:[%s6205_s0] sm:$0xff] }
   0x2   :  { %v4340_v3 = vpack.c.bf16 %v3500_v1, %v3499_v0  ;;  %vm4649_vm2 = vmpackc.low %vm964_vm0, %vm4594_vm1  ;;  %v862_v5 = vld [vmem:[%s6206_s1] sm:$0xff]  ;;  %3961 = vmatprep.mubr.msk.f32.mxu0 %vm867_vm3, %v4647_v2  ;;  %v863_v6 = vld [vmem:[%s6206_s1 + $0x8] sm:$0x1] }
   0x3   :  { %v4346_v7 = vpack.c.bf16 %v863_v6, %v862_v5  ;;  %v4668_v8 = vld [vmem:[%s6205_s0 + $0x8] sm:$0xff]  ;;  %v4675_v9 = vld [vmem:[%s6205_s0 + $0x10] sm:$0xff]  ;;  %v4686_v10 = vld [vmem:[%s6205_s0 + $0x18] sm:$0xff] }
   0x4   :  { %4342 = vmatprep.subr.msk.bf16.mxu0 %vm4649_vm2, %v4340_v3  ;;  %v4691_v11 = vld [vmem:[%s6205_s0 + $0x20] sm:$0xff]  ;;  %v4700_v12 = vld [vmem:[%s6205_s0 + $0x28] sm:$0xff]  ;;  %v4705_v13 = vld [vmem:[%s6205_s0 + $0x30] sm:$0xff] }
   0x5   :  { %4345 = vmatpush3.bf16.msk.msra.mxu0 %vm4649_vm2, %v4340_v3  ;;  %v4714_v14 = vld [vmem:[%s6205_s0 + $0x38] sm:$0xff]  ;;  %v3567_v15 = vld [vmem:[%s6206_s1 + $0x20] sm:$0xff]  ;;  %v3568_v17 = vld [vmem:[%s6206_s1 + $0x28] sm:$0x1] }
   0x6   :  { %4348 = vmatprep.subr.msk.bf16.mxu0 %vm4649_vm2, %v4346_v7  ;;  %v4722_v16 = vld [vmem:[%s6205_s0 + $0x40] sm:$0xff]  ;;  %v4727_v18 = vpack.c.bf16 %v3568_v17, %v3567_v15 }
   0x8   :  { %3962 = vmatmul.mubr.msk.f32.vlgmr.msra.gmra.mrb[0].mxu0 %vm867_vm3, %v4668_v8 }
   0x9   :  { %4351 = vmatpush3.bf16.msk.msra.mxu0 %vm4649_vm2, %v4346_v7  ;;  %3964 = vmatprep.mubr.msk.f32.mxu0 %vm867_vm3, %v4675_v9 }
   0xc   :  { %3965 = vmatmul.mubr.msk.f32.gmra.mrb[2].mxu0 %vm867_vm3, %v4686_v10 }
   0xd   :  { %3967 = vmatprep.mubr.msk.f32.mxu0 %vm867_vm3, %v4691_v11 }
  0x10   :  { %3968 = vmatmul.mubr.msk.f32.gmra.mrb[4].mxu0 %vm867_vm3, %v4700_v12 }
  0x11   :  { %3970 = vmatprep.mubr.msk.f32.mxu0 %vm867_vm3, %v4705_v13 }
  0x12   :  { %12 = vsyncpa [#allocation3], 0  ;;  %v4736_v19 = vld [vmem:[%s6205_s0 + $0x48] sm:$0xff]  ;;  %4354 = vmatprep.subr.msk.bf16.mxu0 %vm4649_vm2, %v4727_v18  ;;  %v4744_v20 = vld [vmem:[%s6205_s0 + $0x50] sm:$0xff]  ;;  %v59_v28 = vlaneseq  ;;  %v6213_v30 = vrot.slane %v4647_v2, 1  ;;  %v702_v31 = vrot.slane %v4668_v8, 1 }
  0x13   :  { %v4753_v21 = vld [vmem:[%s6205_s0 + $0x58] sm:$0xff]  ;;  %v4758_v22 = vld [vmem:[%s6205_s0 + $0x60] sm:$0xff]  ;;  %v4767_v23 = vld [vmem:[%s6205_s0 + $0x68] sm:$0xff]  ;;  %v703_v32 = vrot.slane %v4675_v9, 1  ;;  %v704_v33 = vrot.slane %v4686_v10, 1  ;;  %v705_v36 = vrot.slane %v4691_v11, 1 }
  0x14   :  { %3971 = vmatmul.mubr.msk.f32.gmra.mrb[6].mxu0 %vm867_vm3, %v4714_v14  ;;  %v4772_v24 = vld [vmem:[%s6205_s0 + $0x70] sm:$0xff]  ;;  %v4781_v25 = vld [vmem:[%s6205_s0 + $0x78] sm:$0xff]  ;;  %v4786_v26 = vld [vmem:[%s6205_s0 + $0x80] sm:$0xff]  ;;  %v4815_v35 = vshrl.u32 %v59_v28, 7  ;;  %v706_v37 = vrot.slane %v4700_v12, 1  ;;  %v707_v39 = vrot.slane %v4705_v13, 1 }
  0x15   :  { %3973 = vmatprep.mubr.msk.f32.mxu0 %vm867_vm3, %v4722_v16  ;;  %v4795_v27 = vld [vmem:[%s6205_s0 + $0x88] sm:$0xff]  ;;  %v4800_v29 = vld [vmem:[%s6205_s0 + $0x90] sm:$0xff]  ;;  %v4813_v34 = vld [vmem:[%s6205_s0 + $0x98] sm:$0xff]  ;;  %v708_v40 = vrot.slane %v4714_v14, 1  ;;  %v709_v42 = vrot.slane %v4722_v16, 1  ;;  %v710_v43 = vrot.slane %v4736_v19, 1 }
  0x16   :  { %v4822_v38 = vld [vmem:[%s6205_s0 + $0xa0] sm:$0xff]  ;;  %vm6215_vm4 = vcmp.lt.s32.totalorder %v4815_v35, 7  ;;  %v4842_v44 = vld [vmem:[%s6205_s0 + $0xa8] sm:$0xff]  ;;  %v711_v47 = vrot.slane %v4744_v20, 1  ;;  %v712_v48 = vrot.slane %v4753_v21, 1  ;;  %v4857_v49 = vld [vmem:[%s6205_s0 + $0xb0] sm:$0xff] }
  0x17   :  { %v4833_v41 = vsel %vm6215_vm4, %v6213_v30, %v702_v31  ;;  %v4846_v45 = vsel %vm6215_vm4, %v702_v31, %v703_v32  ;;  %v4850_v46 = vsel %vm6215_vm4, %v703_v32, %v704_v33  ;;  %v4861_v50 = vsel %vm6215_vm4, %v704_v33, %v705_v36  ;;  %v4884_v56 = vld [vmem:[%s6205_s0 + $0xb8] sm:$0xff]  ;;  %v4899_v61 = vld [vmem:[%s6205_s0 + $0xc0] sm:$0xff]  ;;  %v4929_v17 = vld [vmem:[%s6205_s0 + $0xc8] sm:$0xff]  ;;  %s4595_s9 = smov [#allocation2]  }
  0x18   :  { %3974 = vmatmul.mubr.msk.f32.gmra.mrb[8].mxu0 %vm867_vm3, %v4736_v19  ;;  %v4865_v51 = vsel %vm6215_vm4, %v705_v36, %v706_v37  ;;  %v4869_v52 = vsel %vm6215_vm4, %v706_v37, %v707_v39  ;;  %v713_v53 = vrot.slane %v4758_v22, 1  ;;  %v714_v54 = vrot.slane %v4767_v23, 1  ;;  %v4935_v31 = vld [vmem:[%s6205_s0 + $0xd0] sm:$0xff]  ;;  %v4949_v37 = vld [vmem:[%s6205_s0 + $0xf8] sm:$0xff]  ;;  %s3488_s10 = sshll.u32 %s4595_s9, 4  ;;  %s3489_s10 = int_to_ptr.vmem [resolvable:$true] %s3488_s10 }
  0x19   :  { %3976 = vmatprep.mubr.msk.f32.mxu0 %vm867_vm3, %v4744_v20  ;;  %v4877_v55 = vsel %vm6215_vm4, %v707_v39, %v708_v40  ;;  %v4888_v57 = vsel %vm6215_vm4, %v708_v40, %v709_v42  ;;  %v4892_v58 = vsel %vm6215_vm4, %v709_v42, %v710_v43  ;;  %v715_v59 = vrot.slane %v4772_v24, 1  ;;  %s4570_s1 = scalar_lea.vmem %s3489_s10, 256  ;;  %p4575_p1 = scmp.lt.s32.totalorder %s3489_s10, %s3489_s10 }
  0x1a   :  { %v716_v60 = vrot.slane %v4781_v25, 1  ;;  %v4903_v62 = vsel %vm6215_vm4, %v710_v43, %v711_v47  ;;  %v4907_v63 = vsel %vm6215_vm4, %v711_v47, %v712_v48  ;;  %v717_v0 = vrot.slane %v4786_v26, 1  ;;  %p4571_p0 = scmp.ne.s32.totalorder %s3489_s10, %s4570_s1  ;;  %p4576_p2 = scmp.lt.s32.totalorder %s4570_s1, %s4570_s1 }
  0x1b   :  { %v718_v1 = vrot.slane %v4795_v27, 1  ;;  %v719_v3 = vrot.slane %v4800_v29, 1  ;;  %v4916_v5 = vsel %vm6215_vm4, %v712_v48, %v713_v53  ;;  %v4920_v6 = vsel %vm6215_vm4, %v713_v53, %v714_v54 }
  0x1c   :  { %3977 = vmatmul.mubr.msk.f32.gmra.mrb[10].mxu0 %vm867_vm3, %v4753_v21  ;;  %6259 = vst [vmem:[#allocation5_spill] sm:$0xff] %v4916_v5  ;;  %6260 = vst [vmem:[#allocation6_spill] sm:$0xff] %v4920_v6  ;;  %v720_v7 = vrot.slane %v4813_v34, 1  ;;  %v721_v15 = vrot.slane %v4822_v38, 1  ;;  %v722_v28 = vrot.slane %v4842_v44, 1  ;;  %v4939_v32 = vsel %vm6215_vm4, %v714_v54, %v715_v59  ;;  %p4577_p3 = por %p4576_p2, %p4575_p1 }
  0x1d   :  { %3979 = vmatprep.mubr.msk.f32.mxu0 %vm867_vm3, %v4758_v22  ;;  %6261 = vst [vmem:[#allocation7_spill] sm:$0xff] %v4939_v32  ;;  %v4943_v33 = vsel %vm6215_vm4, %v715_v59, %v716_v60  ;;  %v723_v36 = vrot.slane %v4857_v49, 1  ;;  %v4953_v39 = vsel %vm6215_vm4, %v716_v60, %v717_v0  ;;  %v4957_v40 = vsel %vm6215_vm4, %v717_v0, %v718_v1  ;;  %v4975_v59 = vld [vmem:[%s6205_s0 + $0xd8] sm:$0xff]  ;;  %v4980_v60 = vld [vmem:[%s6205_s0 + $0xe0] sm:$0xff] }
  0x1e   :  { %6262 = vst [vmem:[#allocation8_spill] sm:$0xff] %v4943_v33  ;;  %6263 = vst [vmem:[#allocation9_spill] sm:$0xff] %v4953_v39  ;;  %v540_v42 = vrot.slane %v4647_v2, 7  ;;  %v724_v43 = vrot.slane %v4884_v56, 1  ;;  %v725_v47 = vrot.slane %v4899_v61, 1  ;;  %v4966_v48 = vsel %vm6215_vm4, %v718_v1, %v719_v3  ;;  %v5000_v33 = vld [vmem:[%s6205_s0 + $0xe8] sm:$0xff]  ;;  %p4578_p4 = pnand %p4577_p3, %p4571_p0 }
  0x1f   :  { %6264 = vst [vmem:[#allocation10_spill] sm:$0xff] %v4957_v40  ;;  %6265 = vst [vmem:[#allocation11_spill] sm:$0xff] %v4966_v48  ;;  %v726_v53 = vrot.slane %v4929_v17, 1  ;;  %v727_v54 = vrot.slane %v4935_v31, 1  ;;  %v4984_v0 = vsel %vm6215_vm4, %v719_v3, %v720_v7  ;;  %v4988_v1 = vsel %vm6215_vm4, %v720_v7, %v721_v15  ;;  %v5015_v40 = vld [vmem:[%s6205_s0 + $0xf0] sm:$0xff] }
  0x20   :  { %3980 = vmatmul.mubr.msk.f32.gmra.mrb[12].mxu0 %vm867_vm3, %v4767_v23  ;;  %6266 = vst [vmem:[#allocation12_spill] sm:$0xff] %v4984_v0  ;;  %6267 = vst [vmem:[#allocation13_spill] sm:$0xff] %v4988_v1  ;;  %v728_v30 = vrot.slane %v4975_v59, 1  ;;  %v729_v48 = vrot.slane %v4980_v60, 1  ;;  %v4995_v39 = vsel %vm6215_vm4, %v721_v15, %v722_v28  ;;  %v96_v3 = vand.u32 15, %v4815_v35 }
  0x21   :  { %3982 = vmatprep.mubr.msk.f32.mxu0 %vm867_vm3, %v4772_v24  ;;  %6268 = vst [vmem:[#allocation14_spill] sm:$0xff] %v4995_v39  ;;  %vm6220_vm5 = vcmp.lt.s32.totalorder %v4815_v35, 1  ;;  %v62_v7 = vadd.s32 16, %v4815_v35  ;;  %v5007_v1 = vsel %vm6215_vm4, %v722_v28, %v723_v36  ;;  %v730_v15 = vrot.slane %v5000_v33, 1 }
  0x22   :  { %6269 = vst [vmem:[#allocation15_spill] sm:$0xff] %v5007_v1  ;;  %v5019_v39 = vsel %vm6215_vm4, %v723_v36, %v724_v43  ;;  %v5023_v0 = vsel %vm6215_vm4, %v724_v43, %v725_v47  ;;  %v542_v28 = vrot.slane %v4675_v9, 7  ;;  %v731_v1 = vrot.slane %v5015_v40, 1 }
  0x23   :  { %6270 = vst [vmem:[#allocation16_spill] sm:$0xff] %v5019_v39  ;;  %6271 = vst [vmem:[#allocation17_spill] sm:$0xff] %v5023_v0  ;;  %v5031_v32 = vsel %vm6215_vm4, %v725_v47, %v726_v53  ;;  %v732_v6 = vrot.slane %v4949_v37, 1  ;;  %v6273_v36 = vrot.slane %v4949_v37, 7  ;;  %v64_v43 = vadd.s32 32, %v4815_v35 }
  0x24   :  { %3983 = vmatmul.mubr.msk.f32.gmra.mrb[14].mxu0 %vm867_vm3, %v4781_v25  ;;  %6272 = vst [vmem:[#allocation18_spill] sm:$0xff] %v5031_v32  ;;  %v5041_v9 = vsel %vm6215_vm4, %v726_v53, %v727_v54  ;;  %vm5043_vm6 = vcmp.eq.s32.totalorder %v96_v3, 0  ;;  %v6274_v0 = vmov 0  ;;  %v110_v5 = vand.u32 15, %v62_v7 }
  0x25   :  { %3985 = vmatprep.mubr.msk.f32.mxu0 %vm867_vm3, %v4786_v26  ;;  %v604_v39 = vsel %vm6220_vm5, %v6273_v36, %v540_v42  ;;  %v6275_v0 = vsel %vm5043_vm6, 4294967295, %v6274_v0  ;;  %v5049_v47 = vsel %vm6215_vm4, %v727_v54, %v728_v30  ;;  %v5053_v32 = vsel %vm6215_vm4, %v728_v30, %v729_v48 }
  0x26   :  { %6276 = vst [vmem:[#allocation19_spill] sm:$0xff] %v6275_v0  ;;  %v5059_v53 = vsel %vm6215_vm4, %v729_v48, %v730_v15  ;;  %v541_v3 = vrot.slane %v4668_v8, 7  ;;  %v5066_v54 = vsel %vm6215_vm4, %v730_v15, %v731_v1  ;;  %v544_v7 = vrot.slane %v4691_v11, 7  ;;  %v3606_v0 = vld [vmem:[%s6208_s3 + $0x58] sm:$0xff] }
  0x27   :  { %6277 = vst [vmem:[#allocation20_spill] sm:$0xff] %v5059_v53  ;;  %6278 = vst [vmem:[#allocation21_spill] sm:$0xff] %v5066_v54  ;;  %v669_v30 = vsel %vm5043_vm6, 0.0, %v604_v39  ;;  %v5073_v36 = vsel %vm6215_vm4, %v731_v1, %v732_v6  ;;  %v6280_v48 = vrot.slane %v4647_v2, 1  ;;  %vm5081_vm7 = vcmp.eq.s32.totalorder %v110_v5, 0  ;;  %v3603_v2 = vld [vmem:[%s6208_s3 + $0x40] sm:$0xff] }
  0x28   :  { %3986 = vmatmul.mubr.msk.f32.gmra.mrb[16].mxu0 %vm867_vm3, %v4795_v27  ;;  %6279 = vst [vmem:[#allocation22_spill] sm:$0xff] %v5073_v36  ;;  %v602_v11 = vsel %vm6220_vm5, %v541_v3, %v542_v28  ;;  %v124_v15 = vand.u32 15, %v64_v43  ;;  %v66_v39 = vadd.s32 48, %v4815_v35  ;;  %v3604_v5 = vld [vmem:[%s6208_s3 + $0x48] sm:$0xff]  ;;  %v543_v1 = vrot.slane %v4686_v10, 7  ;;  %v3607_v10 = vld [vmem:[%s6208_s3 + $0x60] sm:$0xff] }
  0x29   :  { %3988 = vmatprep.mubr.msk.f32.mxu0 %vm867_vm3, %v4800_v29  ;;  %v5079_v8 = vsel %vm6215_vm4, %v732_v6, %v6280_v48  ;;  %v3605_v6 = vld [vmem:[%s6208_s3 + $0x50] sm:$0xff]  ;;  %v603_v43 = vsel %vm6220_vm5, %v540_v42, %v541_v3  ;;  %v4358_v48 = vpack.c.bf16 %v3604_v5, %v3603_v2  ;;  %v671_v36 = vsel %vm5081_vm7, 0.0, %v602_v11 }
  0x2a   :  { %6281 = vst [vmem:[#allocation23_spill] sm:$0xff] %v5079_v8  ;;  %v546_v8 = vrot.slane %v4705_v13, 7  ;;  %v4362_v54 = vpack.c.bf16 %v3606_v0, %v3605_v6  ;;  %vm5115_vm8 = vcmp.eq.s32.totalorder %v124_v15, 0  ;;  %v600_v3 = vsel %vm6220_vm5, %v543_v1, %v544_v7 }
  0x2b   :  { %v138_v13 = vand.u32 15, %v66_v39  ;;  %v68_v2 = vadd.s32 64, %v4815_v35  ;;  %4359 = vmatprep.subr.bf16.mxu1 %v4358_v48  ;;  %v545_v0 = vrot.slane %v4700_v12, 7  ;;  %v601_v11 = vsel %vm6220_vm5, %v542_v28, %v543_v1 }
  0x2c   :  { %3989 = vmatmul.mubr.msk.f32.gmra.mrb[18].mxu0 %vm867_vm3, %v4813_v34  ;;  %4361 = vmatpush3.bf16.msra.mxu1 %v4358_v48  ;;  %v548_v39 = vrot.slane %v4722_v16, 7  ;;  %v673_v5 = vsel %vm5115_vm8, 0.0, %v600_v3  ;;  %v547_v28 = vrot.slane %v4714_v14, 7  ;;  %v72_v14 = vadd.s32 96, %v4815_v35 }
  0x2d   :  { %3991 = vmatprep.mubr.msk.f32.mxu0 %vm867_vm3, %v4822_v38  ;;  %4363 = vmatprep.subr.bf16.mxu1 %v4362_v54  ;;  %vm5133_vm9 = vcmp.eq.s32.totalorder %v138_v13, 0  ;;  %v598_v4 = vsel %vm6220_vm5, %v545_v0, %v546_v8  ;;  %v152_v12 = vand.u32 15, %v68_v2  ;;  %v599_v16 = vsel %vm6220_vm5, %v544_v7, %v545_v0 }
  0x2e   :  { %v675_v1 = vsel %vm5133_vm9, 0.0, %v598_v4  ;;  %v549_v7 = vrot.slane %v4736_v19, 7  ;;  %v180_v2 = vand.u32 15, %v72_v14  ;;  %v74_v19 = vadd.s32 112, %v4815_v35 }
  0x2f   :  { %vm5148_vm10 = vcmp.eq.s32.totalorder %v152_v12, 0  ;;  %v551_v0 = vrot.slane %v4753_v21, 7  ;;  %v76_v21 = vadd.s32 128, %v4815_v35  ;;  %v553_v12 = vrot.slane %v4767_v23, 7 }
  0x30   :  { %3992 = vmatmul.mubr.msk.f32.gmra.mrb[20].mxu0 %vm867_vm3, %v4842_v44  ;;  %4365 = vmatpush3.bf16.msra.mxu1 %v4362_v54  ;;  %v596_v54 = vsel %vm6220_vm5, %v547_v28, %v548_v39  ;;  %vm5178_vm12 = vcmp.eq.s32.totalorder %v180_v2, 0  ;;  %v194_v4 = vand.u32 15, %v74_v19  ;;  %v78_v23 = vadd.s32 144, %v4815_v35 }
  0x31   :  { %3994 = vmatprep.mubr.msk.f32.mxu0 %vm867_vm3, %v4857_v49 }
  0x32   :  { %vm5193_vm13 = vcmp.eq.s32.totalorder %v194_v4, 0 }
  0x34   :  { %3995 = vmatmul.mubr.msk.f32.gmra.mrb[22].mxu0 %vm867_vm3, %v4884_v56 }
  0x35   :  { %3997 = vmatprep.mubr.msk.f32.mxu0 %vm867_vm3, %v4899_v61 }
  0x38   :  { %3998 = vmatmul.mubr.msk.f32.gmra.mrb[24].mxu0 %vm867_vm3, %v4929_v17 }
  0x39   :  { %4000 = vmatprep.mubr.msk.f32.mxu0 %vm867_vm3, %v4935_v31 }
  0x3c   :  { %4001 = vmatmul.mubr.msk.f32.gmra.mrb[26].mxu0 %vm867_vm3, %v4975_v59 }
  0x3d   :  { %4003 = vmatprep.mubr.msk.f32.mxu0 %vm867_vm3, %v4980_v60 }
  0x40   :  { %4004 = vmatmul.mubr.msk.f32.gmra.mrb[28].mxu0 %vm867_vm3, %v5000_v33 }
  0x41   :  { %4006 = vmatprep.mubr.msk.f32.mxu0 %vm867_vm3, %v5015_v40 }
  0x44   :  { %4007 = vmatmul.mubr.msk.f32.gmra.mrb[30].mxu0 %vm867_vm3, %v4949_v37 }
  0x45   :  { %4013 = vmatprep.mubr.msk.f32.mxu0 %vm867_vm3, %v669_v30  ;;  %v3608_v30 = vld [vmem:[%s6208_s3 + $0x68] sm:$0xff] }
  0x46   :  { %v4366_v15 = vpack.c.bf16 %v3608_v30, %v3607_v10  ;;  %v552_v10 = vrot.slane %v4758_v22, 7  ;;  %v677_v30 = vsel %vm5148_vm10, 0.0, %v596_v54  ;;  %v595_v22 = vsel %vm6220_vm5, %v548_v39, %v549_v7 }
  0x47   :  { %v556_v39 = vrot.slane %v4786_v26, 7  ;;  %v555_v54 = vrot.slane %v4781_v25, 7  ;;  %v80_v25 = vadd.s32 160, %v4815_v35 }
  0x48   :  { %4014 = vmatmul.mubr.msk.f32.vlgmr.msra.gmra.mrb[0].mxu0 %vm867_vm3, %v603_v43  ;;  %4367 = vmatprep.subr.bf16.mxu1 %v4366_v15  ;;  %v591_v26 = vsel %vm6220_vm5, %v552_v10, %v553_v12 }
  0x49   :  { %4357 = vmatpush3.bf16.msk.msra.mxu0 %vm4649_vm2, %v4727_v18  ;;  %4016 = vmatprep.mubr.msk.f32.mxu0 %vm867_vm3, %v671_v36  ;;  %v70_v18 = vadd.s32 80, %v4815_v35  ;;  %v550_v36 = vrot.slane %v4744_v20, 7  ;;  %v597_v20 = vsel %vm6220_vm5, %v546_v8, %v547_v28  ;;  %v554_v8 = vrot.slane %v4772_v24, 7 }
  0x4a   :  { %4369 = vmatpush3.bf16.msra.mxu1 %v4366_v15 }
  0x4b   :  { %v166_v48 = vand.u32 15, %v70_v18  ;;  %v594_v13 = vsel %vm6220_vm5, %v549_v7, %v550_v36  ;;  %v593_v24 = vsel %vm6220_vm5, %v550_v36, %v551_v0  ;;  %v558_v36 = vrot.slane %v4800_v29, 7 }
  0x4c   :  { %4017 = vmatmul.mubr.msk.f32.gmra.mrb[2].mxu0 %vm867_vm3, %v601_v11  ;;  %v588_v7 = vsel %vm6220_vm5, %v555_v54, %v556_v39  ;;  %v589_v29 = vsel %vm6220_vm5, %v554_v8, %v555_v54  ;;  %v566_v54 = vrot.slane %v4935_v31, 7 }
  0x4d   :  { %4019 = vmatprep.mubr.msk.f32.mxu0 %vm867_vm3, %v673_v5  ;;  %vm5163_vm11 = vcmp.eq.s32.totalorder %v166_v48, 0  ;;  %v592_v5 = vsel %vm6220_vm5, %v551_v0, %v552_v10  ;;  %v560_v10 = vrot.slane %v4822_v38, 7  ;;  %v236_v0 = vand.u32 15, %v80_v25 }
  0x4e   :  { %v679_v11 = vsel %vm5163_vm11, 0.0, %v594_v13  ;;  %v681_v18 = vsel %vm5178_vm12, 0.0, %v592_v5  ;;  %v568_v25 = vrot.slane %v4980_v60, 7 }
  0x4f   :  { %vm5238_vm0 = vcmp.eq.s32.totalorder %v236_v0, 0 }
  0x50   :  { %4020 = vmatmul.mubr.msk.f32.gmra.mrb[4].mxu0 %vm867_vm3, %v599_v16  ;;  %v590_v16 = vsel %vm6220_vm5, %v553_v12, %v554_v8  ;;  %v562_v8 = vrot.slane %v4857_v49, 7  ;;  %v561_v12 = vrot.slane %v4842_v44, 7  ;;  %v86_v44 = vadd.s32 208, %v4815_v35 }
  0x51   :  { %4022 = vmatprep.mubr.msk.f32.mxu0 %vm867_vm3, %v675_v1  ;;  %v208_v1 = vand.u32 15, %v76_v21  ;;  %v683_v48 = vsel %vm5193_vm13, 0.0, %v590_v16 }
  0x52   :  { %v582_v16 = vsel %vm6220_vm5, %v561_v12, %v562_v8 }
  0x53   :  { %vm5208_vm14 = vcmp.eq.s32.totalorder %v208_v1, 0 }
  0x54   :  { %4023 = vmatmul.mubr.msk.f32.gmra.mrb[6].mxu0 %vm867_vm3, %v597_v20  ;;  %v222_v20 = vand.u32 15, %v78_v23  ;;  %v685_v13 = vsel %vm5208_vm14, 0.0, %v588_v7  ;;  %v563_v23 = vrot.slane %v4884_v56, 7  ;;  %v278_v7 = vand.u32 15, %v86_v44 }
  0x55   :  { %4025 = vmatprep.mubr.msk.f32.mxu0 %vm867_vm3, %v677_v30  ;;  %v557_v30 = vrot.slane %v4795_v27, 7  ;;  %v82_v27 = vadd.s32 176, %v4815_v35  ;;  %v88_v56 = vadd.s32 224, %v4815_v35 }
  0x56   :  { %vm5223_vm15 = vcmp.eq.s32.totalorder %v222_v20, 0  ;;  %v565_v20 = vrot.slane %v4929_v17, 7  ;;  %v581_v31 = vsel %vm6220_vm5, %v562_v8, %v563_v23  ;;  %vm5283_vm4 = vcmp.eq.s32.totalorder %v278_v7, 0 }
  0x57   :  { %v586_v19 = vsel %vm6220_vm5, %v557_v30, %v558_v36  ;;  %v587_v38 = vsel %vm6220_vm5, %v556_v39, %v557_v30  ;;  %v250_v21 = vand.u32 15, %v82_v27  ;;  %v90_v17 = vadd.s32 240, %v4815_v35 }
  0x58   :  { %4026 = vmatmul.mubr.msk.f32.gmra.mrb[8].mxu0 %vm867_vm3, %v595_v22  ;;  %v559_v22 = vrot.slane %v4813_v34, 7  ;;  %v84_v34 = vadd.s32 192, %v4815_v35  ;;  %v570_v27 = vrot.slane %v5015_v40, 7  ;;  %v69_v7 = vadd.s32 72, %v4815_v35 }
  0x59   :  { %4028 = vmatprep.mubr.msk.f32.mxu0 %vm867_vm3, %v679_v11  ;;  %v687_v11 = vsel %vm5223_vm15, 0.0, %v586_v19  ;;  %vm5253_vm1 = vcmp.eq.s32.totalorder %v250_v21, 0  ;;  %v567_v19 = vrot.slane %v4975_v59, 7  ;;  %v306_v8 = vand.u32 15, %v90_v17 }
  0x5a   :  { %v584_v4 = vsel %vm6220_vm5, %v559_v22, %v560_v10  ;;  %v585_v49 = vsel %vm6220_vm5, %v558_v36, %v559_v22  ;;  %v264_v1 = vand.u32 15, %v84_v34  ;;  %v6304_v36 = vmov 0 }
  0x5b   :  { %v689_v39 = vsel %vm5238_vm0, 0.0, %v584_v4  ;;  %v6308_v22 = vmov 0  ;;  %v569_v59 = vrot.slane %v5000_v33, 7  ;;  %v61_v4 = vadd.s32 8, %v4815_v35 }
  0x5c   :  { %4029 = vmatmul.mubr.msk.f32.gmra.mrb[10].mxu0 %vm867_vm3, %v593_v24  ;;  %v564_v24 = vrot.slane %v4899_v61, 7  ;;  %v583_v61 = vsel %vm6220_vm5, %v560_v10, %v561_v12  ;;  %vm5268_vm2 = vcmp.eq.s32.totalorder %v264_v1, 0  ;;  %v578_v10 = vsel %vm6220_vm5, %v565_v20, %v566_v54 }
  0x5d   :  { %4031 = vmatprep.mubr.msk.f32.mxu0 %vm867_vm3, %v681_v18  ;;  %v6302_v18 = vmov 0  ;;  %v6305_v36 = vsel %vm5268_vm2, 4294967295, %v6304_v36  ;;  %v695_v0 = vsel %vm5283_vm4, 0.0, %v578_v10  ;;  %v6310_v21 = vmov 0 }
  0x5e   :  { %v6303_v18 = vsel %vm5253_vm1, 4294967295, %v6302_v18  ;;  %v579_v60 = vsel %vm6220_vm5, %v564_v24, %v565_v20  ;;  %v574_v34 = vsel %vm6220_vm5, %v569_v59, %v570_v27  ;;  %v575_v33 = vsel %vm6220_vm5, %v568_v25, %v569_v59  ;;  %v6340_v59 = vld [vmem:[#allocation8_spill] sm:$0xff] }
  0x5f   :  { %v6313_v1 = vmov 0  ;;  %v71_v20 = vadd.s32 88, %v4815_v35  ;;  %v75_v10 = vadd.s32 120, %v4815_v35  ;;  %v6332_v17 = vmov 0 }
  0x60   :  { %4032 = vmatmul.mubr.msk.f32.gmra.mrb[12].mxu0 %vm867_vm3, %v591_v26  ;;  %v691_v26 = vsel %vm5253_vm1, 0.0, %v582_v16 }
  0x61   :  { %4034 = vmatprep.mubr.msk.f32.mxu0 %vm867_vm3, %v683_v48  ;;  %v580_v48 = vsel %vm6220_vm5, %v563_v23, %v564_v24  ;;  %v63_v24 = vadd.s32 24, %v4815_v35  ;;  %v65_v23 = vadd.s32 40, %v4815_v35 }
  0x62   :  { %v693_v30 = vsel %vm5268_vm2, 0.0, %v580_v48  ;;  %v6319_v48 = vmov 0 }
  0x63   :  { %v117_v44 = vand.u32 15, %v63_v24 }
  0x64   :  { %4035 = vmatmul.mubr.msk.f32.gmra.mrb[14].mxu0 %vm867_vm3, %v589_v29  ;;  %v6306_v29 = vmov 0 }
  0x65   :  { %4037 = vmatprep.mubr.msk.f32.mxu0 %vm867_vm3, %v685_v13  ;;  %v6307_v29 = vsel %vm5283_vm4, 4294967295, %v6306_v29  ;;  %v292_v13 = vand.u32 15, %v88_v56  ;;  %vm5312_vm4 = vcmp.eq.s32.totalorder %v306_v8, 0  ;;  %v6322_v56 = vmov 0 }
  0x66   :  { %v6311_v21 = vsel %vm5312_vm4, 4294967295, %v6310_v21  ;;  %v699_v12 = vsel %vm5312_vm4, 0.0, %v574_v34  ;;  %vm5342_vm4 = vcmp.eq.s32.totalorder %v117_v44, 15  ;;  %v79_v8 = vadd.s32 152, %v4815_v35 }
  0x67   :  { %vm5298_vm2 = vcmp.eq.s32.totalorder %v292_v13, 0  ;;  %v6331_v13 = vld [vmem:[#allocation5_spill] sm:$0xff]  ;;  %v83_v44 = vadd.s32 184, %v4815_v35 }
  0x68   :  { %4038 = vmatmul.mubr.msk.f32.gmra.mrb[16].mxu0 %vm867_vm3, %v587_v38  ;;  %v6309_v22 = vsel %vm5298_vm2, 4294967295, %v6308_v22  ;;  %v576_v38 = vsel %vm6220_vm5, %v567_v19, %v568_v25  ;;  %v73_v25 = vadd.s32 104, %v4815_v35  ;;  %v229_v34 = vand.u32 15, %v79_v8 }
  0x69   :  { %4040 = vmatprep.mubr.msk.f32.mxu0 %vm867_vm3, %v687_v11  ;;  %v577_v11 = vsel %vm6220_vm5, %v566_v54, %v567_v19  ;;  %v697_v40 = vsel %vm5298_vm2, 0.0, %v576_v38  ;;  %v131_v54 = vand.u32 15, %v65_v23  ;;  %v77_v19 = vadd.s32 136, %v4815_v35  ;;  %v6350_v23 = vld [vmem:[#allocation12_spill] sm:$0xff] }
  0x6a   :  { %v6369_v8 = vmov 0 }
  0x6b   :  { %v215_v38 = vand.u32 15, %v77_v19 }
  0x6c   :  { %4041 = vmatmul.mubr.msk.f32.gmra.mrb[18].mxu0 %vm867_vm3, %v585_v49  ;;  %v103_v49 = vand.u32 15, %v61_v4  ;;  %v6342_v4 = vmov 0 }
  0x6d   :  { %4043 = vmatprep.mubr.msk.f32.mxu0 %vm867_vm3, %v689_v39  ;;  %v6312_v39 = vrot.slane %v4949_v37, 7  ;;  %v6316_v37 = vmov 0 }
  0x6e   :  { %vm5331_vm2 = vcmp.eq.s32.totalorder %v103_v49, 15  ;;  %v6317_v37 = vsel %vm5342_vm4, 4294967295, %v6316_v37  ;;  %v6346_v49 = vld [vmem:[#allocation11_spill] sm:$0xff] }
  0x6f   :  { %v573_v16 = vsel %vm6220_vm5, %v570_v27, %v6312_v39  ;;  %v6314_v1 = vsel %vm5331_vm2, 4294967295, %v6313_v1  ;;  %6318 = vst [vmem:[#allocation25_spill] sm:$0xff] %v6317_v37  ;;  %vm5353_vm5 = vcmp.eq.s32.totalorder %v131_v54, 15  ;;  %v6337_v27 = vmov 0 }
  0x70   :  { %4044 = vmatmul.mubr.msk.f32.gmra.mrb[20].mxu0 %vm867_vm3, %v583_v61  ;;  %6315 = vst [vmem:[#allocation24_spill] sm:$0xff] %v6314_v1  ;;  %v831_v61 = vsel %vm5331_vm2, 0.0, %v4846_v45  ;;  %v6320_v48 = vsel %vm5353_vm5, 4294967295, %v6319_v48  ;;  %v6347_v39 = vmov 0 }
  0x71   :  { %4046 = vmatprep.mubr.msk.f32.mxu0 %vm867_vm3, %v691_v26  ;;  %v67_v26 = vadd.s32 56, %v4815_v35  ;;  %6321 = vst [vmem:[#allocation26_spill] sm:$0xff] %v6320_v48 }
  0x73   :  { %v145_v45 = vand.u32 15, %v67_v26  ;;  %v6352_v26 = vmov 0 }
  0x74   :  { %4047 = vmatmul.mubr.msk.f32.gmra.mrb[22].mxu0 %vm867_vm3, %v581_v31  ;;  %v6325_v31 = vmov 0 }
  0x75   :  { %4049 = vmatprep.mubr.msk.f32.mxu0 %vm867_vm3, %v693_v30  ;;  %vm5364_vm2 = vcmp.eq.s32.totalorder %v145_v45, 15  ;;  %v6328_v30 = vmov 0  ;;  %v85_v45 = vadd.s32 200, %v4815_v35 }
  0x76   :  { %v6323_v56 = vsel %vm5364_vm2, 4294967295, %v6322_v56 }
  0x77   :  { %6324 = vst [vmem:[#allocation27_spill] sm:$0xff] %v6323_v56 }
  0x78   :  { %4050 = vmatmul.mubr.msk.f32.gmra.mrb[24].mxu0 %vm867_vm3, %v579_v60  ;;  %v6335_v60 = vld [vmem:[#allocation6_spill] sm:$0xff] }
  0x79   :  { %4052 = vmatprep.mubr.msk.f32.mxu0 %vm867_vm3, %v695_v0  ;;  %v6336_v0 = vld [vmem:[#allocation7_spill] sm:$0xff] }
  0x7c   :  { %4053 = vmatmul.mubr.msk.f32.gmra.mrb[26].mxu0 %vm867_vm3, %v577_v11  ;;  %v6341_v11 = vld [vmem:[#allocation9_spill] sm:$0xff] }
  0x7d   :  { %4055 = vmatprep.mubr.msk.f32.mxu0 %vm867_vm3, %v697_v40 }
  0x80   :  { %4056 = vmatmul.mubr.msk.f32.gmra.mrb[28].mxu0 %vm867_vm3, %v575_v33  ;;  %v81_v33 = vadd.s32 168, %v4815_v35 }
  0x81   :  { %4058 = vmatprep.mubr.msk.f32.mxu0 %vm867_vm3, %v699_v12  ;;  %v6345_v12 = vld [vmem:[#allocation10_spill] sm:$0xff] }
  0x84   :  { %4059 = vmatmul.mubr.msk.f32.gmra.mrb[30].mxu0 %vm867_vm3, %v573_v16  ;;  %v243_v16 = vand.u32 15, %v81_v33 }
  0x85   :  { %4065 = vmatprep.mubr.msk.f32.mxu0 %vm867_vm3, %v4833_v41  ;;  %v833_v41 = vsel %vm5342_vm4, 0.0, %v4861_v50  ;;  %v159_v50 = vand.u32 15, %v69_v7  ;;  %v6355_v7 = vld [vmem:[#allocation14_spill] sm:$0xff] }
  0x87   :  { %vm5375_vm4 = vcmp.eq.s32.totalorder %v159_v50, 15 }
  0x88   :  { %4066 = vmatmul.mubr.msk.f32.vlgmr.msra.gmra.mrb[0].mxu0 %vm867_vm3, %v831_v61  ;;  %v6326_v31 = vsel %vm5375_vm4, 4294967295, %v6325_v31  ;;  %v6351_v61 = vld [vmem:[#allocation13_spill] sm:$0xff] }
  0x89   :  { %4068 = vmatprep.mubr.msk.f32.mxu0 %vm867_vm3, %v4850_v46  ;;  %v835_v46 = vsel %vm5353_vm5, 0.0, %v4869_v52  ;;  %6327 = vst [vmem:[#allocation28_spill] sm:$0xff] %v6326_v31  ;;  %v173_v52 = vand.u32 15, %v71_v20  ;;  %v6357_v20 = vmov 0 }
  0x8b   :  { %vm5386_vm5 = vcmp.eq.s32.totalorder %v173_v52, 15  ;;  %v87_v52 = vadd.s32 216, %v4815_v35 }
  0x8c   :  { %4069 = vmatmul.mubr.msk.f32.gmra.mrb[2].mxu0 %vm867_vm3, %v833_v41  ;;  %v6329_v30 = vsel %vm5386_vm5, 4294967295, %v6328_v30  ;;  %v257_v41 = vand.u32 15, %v83_v44  ;;  %v2140_v44 = vld [vmem:[%s6208_s3 + $0x8] sm:$0xff] }
  0x8d   :  { %4071 = vmatprep.mubr.msk.f32.mxu0 %vm867_vm3, %v4865_v51  ;;  %v837_v51 = vsel %vm5364_vm2, 0.0, %v4888_v57  ;;  %6330 = vst [vmem:[#allocation29_spill] sm:$0xff] %v6329_v30  ;;  %v187_v57 = vand.u32 15, %v73_v25  ;;  %v6360_v25 = vld [vmem:[#allocation16_spill] sm:$0xff] }
  0x8f   :  { %vm5397_vm2 = vcmp.eq.s32.totalorder %v187_v57, 15 }
  0x90   :  { %4072 = vmatmul.mubr.msk.f32.gmra.mrb[4].mxu0 %vm867_vm3, %v835_v46  ;;  %v6333_v17 = vsel %vm5397_vm2, 4294967295, %v6332_v17  ;;  %v6356_v46 = vld [vmem:[#allocation15_spill] sm:$0xff] }
  0x91   :  { %4074 = vmatprep.mubr.msk.f32.mxu0 %vm867_vm3, %v4877_v55  ;;  %v839_v55 = vsel %vm5375_vm4, 0.0, %v4903_v62  ;;  %6334 = vst [vmem:[#allocation5_spill] sm:$0xff] %v6333_v17  ;;  %v201_v62 = vand.u32 15, %v75_v10  ;;  %v6362_v10 = vmov 0 }
  0x93   :  { %vm5408_vm4 = vcmp.eq.s32.totalorder %v201_v62, 15  ;;  %v6365_v62 = vld [vmem:[#allocation18_spill] sm:$0xff] }
  0x94   :  { %4075 = vmatmul.mubr.msk.f32.gmra.mrb[6].mxu0 %vm867_vm3, %v837_v51  ;;  %v6338_v27 = vsel %vm5408_vm4, 4294967295, %v6337_v27  ;;  %v845_v40 = vsel %vm5408_vm4, 0.0, %v6341_v11  ;;  %vm5441_vm4 = vcmp.eq.s32.totalorder %v243_v16, 15  ;;  %v271_v51 = vand.u32 15, %v85_v45  ;;  %v6373_v11 = vld [vmem:[#allocation21_spill] sm:$0xff]  ;;  %v2139_v16 = vld [vmem:[%s6208_s3] sm:$0xff] }
  0x95   :  { %4077 = vmatprep.mubr.msk.f32.mxu0 %vm867_vm3, %v4892_v58  ;;  %v841_v58 = vsel %vm5386_vm5, 0.0, %v6331_v13  ;;  %6339 = vst [vmem:[#allocation6_spill] sm:$0xff] %v6338_v27  ;;  %vm5419_vm5 = vcmp.eq.s32.totalorder %v215_v38, 15  ;;  %v6353_v26 = vsel %vm5441_vm4, 4294967295, %v6352_v26  ;;  %v851_v50 = vsel %vm5441_vm4, 0.0, %v6356_v46  ;;  %v2141_v46 = vld [vmem:[%s6208_s3 + $0x10] sm:$0xff] }
  0x96   :  { %v6343_v4 = vsel %vm5419_vm5, 4294967295, %v6342_v4  ;;  %v847_v24 = vsel %vm5419_vm5, 0.0, %v6346_v49  ;;  %6354 = vst [vmem:[#allocation9_spill] sm:$0xff] %v6353_v26  ;;  %vm5452_vm5 = vcmp.eq.s32.totalorder %v257_v41, 15  ;;  %v285_v13 = vand.u32 15, %v87_v52  ;;  %v3610_v49 = vld [vmem:[%s6208_s3 + $0x78] sm:$0xff] }
  0x97   :  { %6344 = vst [vmem:[#allocation7_spill] sm:$0xff] %v6343_v4  ;;  %v6358_v20 = vsel %vm5452_vm5, 4294967295, %v6357_v20 }
  0x98   :  { %4078 = vmatmul.mubr.msk.f32.gmra.mrb[8].mxu0 %vm867_vm3, %v839_v55  ;;  %6359 = vst [vmem:[#allocation10_spill] sm:$0xff] %v6358_v20  ;;  %v6361_v55 = vld [vmem:[#allocation17_spill] sm:$0xff]  ;;  %vm5474_vm4 = vcmp.eq.s32.totalorder %v285_v13, 15 }
  0x99   :  { %4080 = vmatprep.mubr.msk.f32.mxu0 %vm867_vm3, %v4907_v63  ;;  %v843_v63 = vsel %vm5397_vm2, 0.0, %v6336_v0  ;;  %vm5430_vm2 = vcmp.eq.s32.totalorder %v229_v34, 15  ;;  %v853_v57 = vsel %vm5452_vm5, 0.0, %v6361_v55  ;;  %v857_v38 = vsel %vm5474_vm4, 0.0, %v5053_v32  ;;  %v6377_v32 = vld [vmem:[#allocation22_spill] sm:$0xff]  ;;  %v6378_v34 = vld [vmem:[#allocation23_spill] sm:$0xff] }
  0x9a   :  { %v6348_v39 = vsel %vm5430_vm2, 4294967295, %v6347_v39  ;;  %v849_v54 = vsel %vm5430_vm2, 0.0, %v6351_v61  ;;  %vm5463_vm2 = vcmp.eq.s32.totalorder %v271_v51, 15  ;;  %v5521_v61 = vld [vmem:[%s6207_s2] ss:$0 sm:$0xff] }
  0x9b   :  { %6349 = vst [vmem:[#allocation8_spill] sm:$0xff] %v6348_v39  ;;  %v6363_v10 = vsel %vm5463_vm2, 4294967295, %v6362_v10  ;;  %v855_v19 = vsel %vm5463_vm2, 0.0, %v5041_v9 }
  0x9c   :  { %4081 = vmatmul.mubr.msk.f32.gmra.mrb[10].mxu0 %vm867_vm3, %v841_v58  ;;  %6364 = vst [vmem:[#allocation11_spill] sm:$0xff] %v6363_v10  ;;  %v89_v58 = vadd.s32 232, %v4815_v35 }
  0x9d   :  { %4083 = vmatprep.mubr.msk.f32.mxu0 %vm867_vm3, %v6335_v60  ;;  %v6366_v60 = vmov 0 }
  0x9e   :  { %v6367_v60 = vsel %vm5474_vm4, 4294967295, %v6366_v60  ;;  %v299_v0 = vand.u32 15, %v89_v58  ;;  %vm6383_vm4 = vcmp.lt.s32.totalorder %v4815_v35, 7 }
  0x9f   :  { %6368 = vst [vmem:[#allocation12_spill] sm:$0xff] %v6367_v60  ;;  %vm6387_vm1 = vmmov %vm6383_vm4 }
  0xa0   :  { %4084 = vmatmul.mubr.msk.f32.gmra.mrb[12].mxu0 %vm867_vm3, %v843_v63  ;;  %v91_v63 = vadd.s32 248, %v4815_v35  ;;  %vm5485_vm5 = vcmp.eq.s32.totalorder %v299_v0, 15 }
  0xa1   :  { %4086 = vmatprep.mubr.msk.f32.mxu0 %vm867_vm3, %v6340_v59  ;;  %v6370_v8 = vsel %vm5485_vm5, 4294967295, %v6369_v8  ;;  %v6372_v59 = vld [vmem:[#allocation20_spill] sm:$0xff] }
  0xa2   :  { %6371 = vst [vmem:[#allocation13_spill] sm:$0xff] %v6370_v8  ;;  %v313_v9 = vand.u32 15, %v91_v63 }
  0xa4   :  { %4087 = vmatmul.mubr.msk.f32.gmra.mrb[14].mxu0 %vm867_vm3, %v845_v40  ;;  %v859_v40 = vsel %vm5485_vm5, 0.0, %v6373_v11  ;;  %vm5495_vm2 = vcmp.eq.s32.totalorder %v313_v9, 15  ;;  %v2144_v9 = vld [vmem:[%s6208_s3 + $0x28] sm:$0xff]  ;;  %vm6380_vm5 = vcmp.lt.s32.totalorder %v4815_v35, 7 }
  0xa5   :  { %4089 = vmatprep.mubr.msk.f32.mxu0 %vm867_vm3, %v6345_v12  ;;  %v861_v33 = vsel %vm5495_vm2, 0.0, %v6378_v34  ;;  %v3609_v12 = vld [vmem:[%s6208_s3 + $0x70] sm:$0xff] }
  0xa8   :  { %4090 = vmatmul.mubr.msk.f32.gmra.mrb[16].mxu0 %vm867_vm3, %v847_v24  ;;  %v4370_v24 = vpack.c.bf16 %v3610_v49, %v3609_v12 }
  0xa9   :  { %4092 = vmatprep.mubr.msk.f32.mxu0 %vm867_vm3, %v6350_v23  ;;  %v4374_v23 = vpack.c.bf16 %v2140_v44, %v2139_v16 }
  0xaa   :  { %4371 = vmatprep.subr.bf16.mxu1 %v4370_v24 }
  0xab   :  { %4373 = vmatpush3.bf16.msra.mxu1 %v4370_v24 }
  0xac   :  { %4093 = vmatmul.mubr.msk.f32.gmra.mrb[18].mxu0 %vm867_vm3, %v849_v54  ;;  %4375 = vmatprep.subr.bf16.mxu1 %v4374_v23 }
  0xad   :  { %4095 = vmatprep.mubr.msk.f32.mxu0 %vm867_vm3, %v6355_v7 }
  0xb0   :  { %4096 = vmatmul.mubr.msk.f32.gmra.mrb[20].mxu0 %vm867_vm3, %v851_v50  ;;  %v2142_v50 = vld [vmem:[%s6208_s3 + $0x18] sm:$0xff] }
  0xb1   :  { %4098 = vmatprep.mubr.msk.f32.mxu0 %vm867_vm3, %v6360_v25 }
  0xb4   :  { %4099 = vmatmul.mubr.msk.f32.gmra.mrb[22].mxu0 %vm867_vm3, %v853_v57 }
  0xb5   :  { %4101 = vmatprep.mubr.msk.f32.mxu0 %vm867_vm3, %v6365_v62  ;;  %v4378_v62 = vpack.c.bf16 %v2142_v50, %v2141_v46 }
  0xb8   :  { %4102 = vmatmul.mubr.msk.f32.gmra.mrb[24].mxu0 %vm867_vm3, %v855_v19 }
  0xb9   :  { %4104 = vmatprep.mubr.msk.f32.mxu0 %vm867_vm3, %v5049_v47  ;;  %v6374_v47 = vmov 0 }
  0xba   :  { %v6375_v47 = vsel %vm5495_vm2, 4294967295, %v6374_v47  ;;  %vm6379_vm2 = vcmp.lt.s32.totalorder %v4815_v35, 1 }
  0xbb   :  { %6376 = vst [vmem:[#allocation14_spill] sm:$0xff] %v6375_v47 }
  0xbc   :  { %4105 = vmatmul.mubr.msk.f32.gmra.mrb[26].mxu0 %vm867_vm3, %v857_v38  ;;  %v2143_v38 = vld [vmem:[%s6208_s3 + $0x20] sm:$0xff] }
  0xbd   :  { %4107 = vmatprep.mubr.msk.f32.mxu0 %vm867_vm3, %v6372_v59  ;;  %v4382_v24 = vpack.c.bf16 %v2144_v9, %v2143_v38 }
  0xc0   :  { %4108 = vmatmul.mubr.msk.f32.gmra.mrb[28].mxu0 %vm867_vm3, %v859_v40 }
  0xc1   :  { %4110 = vmatprep.mubr.msk.f32.mxu0 %vm867_vm3, %v6377_v32 }
  0xc4   :  { %4111 = vmatmul.mubr.msk.f32.gmra.mrb[30].mxu0 %vm867_vm3, %v861_v33  ;;  %vm6256_vm3 = vcmask 523264  }
 0x15b   :  { %v4067_v54 = vpop.f32.mrb[0].mxu0 }
 0x15c   :  { %v1884_v41 = vadd.f32 %v4067_v54, %v5521_v61  ;;  %v1685_v45 = vpop.f32.mrb[1].mxu0  ;;  %v2145_v54 = vld [vmem:[%s6208_s3 + $0x30] sm:$0xff] }
 0x15d   :  { %v1883_v7 = vadd.f32 %v5521_v61, %v1685_v45 }
 0x15e   :  { %v1916_v51 = vmax.f32 %v1884_v41, 0.0  ;;  %v2146_v41 = vld [vmem:[%s6208_s3 + $0x38] sm:$0xff] }
 0x15f   :  { %v5531_v52 = vmax.f32 %v1883_v7, 0.0  ;;  %v4070_v25 = vpop.f32.mrb[2].mxu0  ;;  %v4386_v9 = vpack.c.bf16 %v2146_v41, %v2145_v54 }
 0x160   :  { %v1948_v55 = vrot.slane %v1916_v51, 7  ;;  %v2044_v57 = vrot.slane %v1916_v51, 1  ;;  %v1886_v13 = vadd.f32 %v4070_v25, %v5521_v61  ;;  %v1695_v58 = vpop.f32.mrb[3].mxu0 }
 0x161   :  { %v6239_v19 = vrot.slane %v5531_v52, 7  ;;  %v6238_v0 = vrot.slane %v5531_v52, 1  ;;  %v1885_v63 = vadd.f32 %v5521_v61, %v1695_v58  ;;  %4129 = vmatprep.mubr.msk.f32.mxu1 %vm6256_vm3, %v5531_v52 }
 0x162   :  { %v1918_v59 = vmax.f32 %v1886_v13, 0.0  ;;  %4130 = vmatmul.mubr.msk.f32.vlgmr.msra.gmra.mrb[0].mxu1 %vm6256_vm3, %v1916_v51 }
 0x163   :  { %v1917_v11 = vmax.f32 %v1885_v63, 0.0  ;;  %v4073_v40 = vpop.f32.mrb[4].mxu0  ;;  %4377 = vmatpush3.bf16.msra.mxu1 %v4374_v23  ;;  %v5550_v32 = vsel %vm6379_vm2, %v6239_v19, %v1948_v55  ;;  %v5556_v34 = vsel %vm6380_vm5, %v6238_v0, %v2044_v57  ;;  %vm6382_vm5 = vmmov %vm6379_vm2 }
 0x164   :  { %6381 = vst [vmem:[#allocation15_spill] sm:$0xff] %v5556_v34  ;;  %v1950_v33 = vrot.slane %v1918_v59, 7  ;;  %v1888_v12 = vadd.f32 %v4073_v40, %v5521_v61  ;;  %v1705_v49 = vpop.f32.mrb[5].mxu0  ;;  %4379 = vmatprep.subr.bf16.mxu1 %v4378_v62  ;;  %v2046_v45 = vrot.slane %v1918_v59, 1 }
 0x165   :  { %v1949_v16 = vrot.slane %v1917_v11, 7  ;;  %v2045_v44 = vrot.slane %v1917_v11, 1  ;;  %v1887_v23 = vadd.f32 %v5521_v61, %v1705_v49  ;;  %4132 = vmatprep.mubr.msk.f32.mxu1 %vm6256_vm3, %v1917_v11 }
 0x166   :  { %v1920_v7 = vmax.f32 %v1888_v12, 0.0  ;;  %4133 = vmatmul.mubr.msk.f32.gmra.mrb[2].mxu1 %vm6256_vm3, %v1918_v59 }
 0x167   :  { %v1919_v46 = vmax.f32 %v1887_v23, 0.0  ;;  %v4076_v50 = vpop.f32.mrb[6].mxu0  ;;  %4381 = vmatpush3.bf16.msra.mxu1 %v4378_v62  ;;  %v5570_v51 = vsel %vm6382_vm5, %v1948_v55, %v1949_v16  ;;  %v5574_v25 = vsel %vm6379_vm2, %v1949_v16, %v1950_v33  ;;  %v5578_v13 = vsel %vm6383_vm4, %v2044_v57, %v2045_v44  ;;  %v3675_v55 = vld [vmem:[%s6208_s3 + $0x80] sm:$0xff]  ;;  %v3676_v57 = vld [vmem:[%s6208_s3 + $0x88] sm:$0xff]  ;;  %vm6386_vm5 = vmmov %vm6379_vm2 }
 0x168   :  { %6384 = vst [vmem:[#allocation16_spill] sm:$0xff] %v5578_v13  ;;  %v1952_v58 = vrot.slane %v1920_v7, 7  ;;  %v1890_v63 = vadd.f32 %v4076_v50, %v5521_v61  ;;  %v1715_v38 = vpop.f32.mrb[7].mxu0  ;;  %4383 = vmatprep.subr.bf16.mxu1 %v4382_v24  ;;  %v2048_v40 = vrot.slane %v1920_v7, 1  ;;  %v5592_v49 = vsel %vm6383_vm4, %v2045_v44, %v2046_v45  ;;  %vm6390_vm4 = vmmov %vm6379_vm2 }
 0x169   :  { %v1951_v59 = vrot.slane %v1919_v46, 7  ;;  %v2047_v62 = vrot.slane %v1919_v46, 1  ;;  %v1889_v11 = vadd.f32 %v5521_v61, %v1715_v38  ;;  %4135 = vmatprep.mubr.msk.f32.mxu1 %vm6256_vm3, %v1919_v46  ;;  %6385 = vst [vmem:[#allocation17_spill] sm:$0xff] %v5592_v49 }
 0x16a   :  { %v1922_v12 = vmax.f32 %v1890_v63, 0.0  ;;  %4136 = vmatmul.mubr.msk.f32.gmra.mrb[4].mxu1 %vm6256_vm3, %v1920_v7  ;;  %v5607_v63 = vpack.c.bf16 %v3676_v57, %v3675_v55 }
 0x16b   :  { %v1921_v16 = vmax.f32 %v1889_v11, 0.0  ;;  %v4079_v23 = vpop.f32.mrb[8].mxu0  ;;  %4385 = vmatpush3.bf16.msra.mxu1 %v4382_v24  ;;  %v5596_v54 = vsel %vm6386_vm5, %v1950_v33, %v1951_v59  ;;  %v5600_v41 = vsel %vm6379_vm2, %v1951_v59, %v1952_v58  ;;  %v5604_v46 = vsel %vm6387_vm1, %v2046_v45, %v2047_v62  ;;  %vm6391_vm5 = vmmov %vm6379_vm2 }
 0x16c   :  { %6388 = vst [vmem:[#allocation18_spill] sm:$0xff] %v5604_v46  ;;  %v1954_v7 = vrot.slane %v1922_v12, 7  ;;  %v1892_v50 = vadd.f32 %v4079_v23, %v5521_v61  ;;  %v1725_v44 = vpop.f32.mrb[9].mxu0  ;;  %4387 = vmatprep.subr.bf16.mxu1 %v4386_v9  ;;  %v2050_v11 = vrot.slane %v1922_v12, 1  ;;  %v5614_v45 = vsel %vm6387_vm1, %v2047_v62, %v2048_v40  ;;  %vm6392_vm2 = vmmov %vm6387_vm1 }
 0x16d   :  { %v1953_v24 = vrot.slane %v1921_v16, 7  ;;  %v2049_v38 = vrot.slane %v1921_v16, 1  ;;  %v1891_v33 = vadd.f32 %v5521_v61, %v1725_v44  ;;  %4138 = vmatprep.mubr.msk.f32.mxu1 %vm6256_vm3, %v1921_v16  ;;  %6389 = vst [vmem:[#allocation20_spill] sm:$0xff] %v5614_v45  ;;  %v2015_v53 = vsel %vm5115_vm8, 0.0, %v5596_v54 }
 0x16e   :  { %v1924_v59 = vmax.f32 %v1892_v50, 0.0  ;;  %4139 = vmatmul.mubr.msk.f32.gmra.mrb[6].mxu1 %vm6256_vm3, %v1922_v12 }
 0x16f   :  { %v1923_v0 = vmax.f32 %v1891_v33, 0.0  ;;  %v4082_v23 = vpop.f32.mrb[10].mxu0  ;;  %4389 = vmatpush3.bf16.msra.mxu1 %v4386_v9  ;;  %v5618_v55 = vsel %vm6390_vm4, %v1952_v58, %v1953_v24  ;;  %v5622_v57 = vsel %vm6391_vm5, %v1953_v24, %v1954_v7  ;;  %v5626_v16 = vsel %vm6392_vm2, %v2048_v40, %v2049_v38  ;;  %vm6395_vm5 = vmmov %vm6390_vm4 }
 0x170   :  { %6393 = vst [vmem:[#allocation21_spill] sm:$0xff] %v5626_v16  ;;  %v1956_v12 = vrot.slane %v1924_v59, 7  ;;  %v1894_v50 = vadd.f32 %v4082_v23, %v5521_v61  ;;  %v1735_v62 = vpop.f32.mrb[11].mxu0  ;;  %4391 = vmatprep.subr.bf16.mxu1 %v5607_v63  ;;  %v2052_v58 = vrot.slane %v1924_v59, 1  ;;  %v5635_v40 = vsel %vm6387_vm1, %v2049_v38, %v2050_v11  ;;  %vm6396_vm2 = vmmov %vm6387_vm1 }
 0x171   :  { %v1955_v44 = vrot.slane %v1923_v0, 7  ;;  %v2051_v9 = vrot.slane %v1923_v0, 1  ;;  %v1893_v33 = vadd.f32 %v5521_v61, %v1735_v62  ;;  %4141 = vmatprep.mubr.msk.f32.mxu1 %vm6256_vm3, %v1923_v0  ;;  %6394 = vst [vmem:[#allocation22_spill] sm:$0xff] %v5635_v40 }
 0x172   :  { %v1926_v19 = vmax.f32 %v1894_v50, 0.0  ;;  %4142 = vmatmul.mubr.msk.f32.gmra.mrb[8].mxu1 %vm6256_vm3, %v1924_v59 }
 0x173   :  { %v1925_v24 = vmax.f32 %v1893_v33, 0.0  ;;  %v4085_v47 = vpop.f32.mrb[12].mxu0  ;;  %v5639_v23 = vsel %vm6390_vm4, %v1954_v7, %v1955_v44  ;;  %v5643_v8 = vsel %vm6395_vm5, %v1955_v44, %v1956_v12  ;;  %v5647_v0 = vsel %vm6396_vm2, %v2050_v11, %v2051_v9  ;;  %vm6399_vm5 = vmmov %vm6390_vm4 }
 0x174   :  { %6397 = vst [vmem:[#allocation23_spill] sm:$0xff] %v5647_v0  ;;  %v1958_v50 = vrot.slane %v1926_v19, 7  ;;  %v1896_v59 = vadd.f32 %v4085_v47, %v5521_v61  ;;  %v1745_v62 = vpop.f32.mrb[13].mxu0  ;;  %v2054_v7 = vrot.slane %v1926_v19, 1  ;;  %v5655_v44 = vsel %vm6387_vm1, %v2051_v9, %v2052_v58  ;;  %vm6400_vm2 = vmmov %vm6387_vm1 }
 0x175   :  { %v1957_v38 = vrot.slane %v1925_v24, 7  ;;  %v2053_v60 = vrot.slane %v1925_v24, 1  ;;  %v1895_v33 = vadd.f32 %v5521_v61, %v1745_v62  ;;  %4144 = vmatprep.mubr.msk.f32.mxu1 %vm6256_vm3, %v1925_v24  ;;  %6398 = vst [vmem:[#allocation30_spill] sm:$0xff] %v5655_v44  ;;  %v2019_v42 = vsel %vm5148_vm10, 0.0, %v5639_v23 }
 0x176   :  { %v1928_v10 = vmax.f32 %v1896_v59, 0.0  ;;  %4145 = vmatmul.mubr.msk.f32.gmra.mrb[10].mxu1 %vm6256_vm3, %v1926_v19 }
 0x177   :  { %v1927_v11 = vmax.f32 %v1895_v33, 0.0  ;;  %v4088_v20 = vpop.f32.mrb[14].mxu0  ;;  %v5659_v47 = vsel %vm6390_vm4, %v1956_v12, %v1957_v38  ;;  %v5663_v26 = vsel %vm6399_vm5, %v1957_v38, %v1958_v50  ;;  %v5667_v24 = vsel %vm6400_vm2, %v2052_v58, %v2053_v60  ;;  %vm6403_vm5 = vmmov %vm6390_vm4  ;;  %v6495_v54 = vld [vmem:[#allocation21_spill] sm:$0xff] }
 0x178   :  { %6401 = vst [vmem:[#allocation31_spill] sm:$0xff] %v5667_v24  ;;  %v1960_v59 = vrot.slane %v1928_v10, 7  ;;  %v1898_v19 = vadd.f32 %v4088_v20, %v5521_v61  ;;  %v1755_v62 = vpop.f32.mrb[15].mxu0  ;;  %v2056_v12 = vrot.slane %v1928_v10, 1  ;;  %v5675_v38 = vsel %vm6387_vm1, %v2053_v60, %v2054_v7  ;;  %vm6404_vm2 = vmmov %vm6387_vm1 }
 0x179   :  { %v1959_v9 = vrot.slane %v1927_v11, 7  ;;  %v2055_v39 = vrot.slane %v1927_v11, 1  ;;  %v1897_v33 = vadd.f32 %v5521_v61, %v1755_v62  ;;  %4147 = vmatprep.mubr.msk.f32.mxu1 %vm6256_vm3, %v1927_v11  ;;  %6402 = vst [vmem:[#allocation32_spill] sm:$0xff] %v5675_v38  ;;  %v2021_v6 = vsel %vm5163_vm11, 0.0, %v5659_v47 }
 0x17a   :  { %v1930_v4 = vmax.f32 %v1898_v19, 0.0  ;;  %4148 = vmatmul.mubr.msk.f32.gmra.mrb[12].mxu1 %vm6256_vm3, %v1928_v10 }
 0x17b   :  { %v1929_v58 = vmax.f32 %v1897_v33, 0.0  ;;  %v4091_v27 = vpop.f32.mrb[16].mxu0  ;;  %v5679_v20 = vsel %vm6390_vm4, %v1958_v50, %v1959_v9  ;;  %v5683_v17 = vsel %vm6403_vm5, %v1959_v9, %v1960_v59  ;;  %v5687_v11 = vsel %vm6404_vm2, %v2054_v7, %v2055_v39  ;;  %vm6407_vm5 = vmmov %vm6390_vm4 }
 0x17c   :  { %6405 = vst [vmem:[#allocation33_spill] sm:$0xff] %v5687_v11  ;;  %v1962_v19 = vrot.slane %v1930_v4, 7  ;;  %v1900_v10 = vadd.f32 %v4091_v27, %v5521_v61  ;;  %v1765_v62 = vpop.f32.mrb[17].mxu0  ;;  %v2058_v50 = vrot.slane %v1930_v4, 1  ;;  %v5695_v9 = vsel %vm6387_vm1, %v2055_v39, %v2056_v12  ;;  %vm6408_vm2 = vmmov %vm6387_vm1  ;;  %v6505_v23 = vld [vmem:[#allocation30_spill] sm:$0xff] }
 0x17d   :  { %v1961_v60 = vrot.slane %v1929_v58, 7  ;;  %v2057_v30 = vrot.slane %v1929_v58, 1  ;;  %v1899_v33 = vadd.f32 %v5521_v61, %v1765_v62  ;;  %4150 = vmatprep.mubr.msk.f32.mxu1 %vm6256_vm3, %v1929_v58  ;;  %6406 = vst [vmem:[#allocation34_spill] sm:$0xff] %v5695_v9  ;;  %v2023_v43 = vsel %vm5178_vm12, 0.0, %v5679_v20 }
 0x17e   :  { %v1932_v38 = vmax.f32 %v1900_v10, 0.0  ;;  %4151 = vmatmul.mubr.msk.f32.gmra.mrb[14].mxu1 %vm6256_vm3, %v1930_v4 }
 0x17f   :  { %v1931_v7 = vmax.f32 %v1899_v33, 0.0  ;;  %v4094_v11 = vpop.f32.mrb[18].mxu0  ;;  %v5699_v27 = vsel %vm6390_vm4, %v1960_v59, %v1961_v60  ;;  %v5703_v31 = vsel %vm6407_vm5, %v1961_v60, %v1962_v19  ;;  %v5707_v58 = vsel %vm6408_vm2, %v2056_v12, %v2057_v30  ;;  %vm6411_vm5 = vmmov %vm6390_vm4 }
 0x180   :  { %6409 = vst [vmem:[#allocation35_spill] sm:$0xff] %v5707_v58  ;;  %v1964_v10 = vrot.slane %v1932_v38, 7  ;;  %v1902_v4 = vadd.f32 %v4094_v11, %v5521_v61  ;;  %v1775_v62 = vpop.f32.mrb[19].mxu0  ;;  %v2060_v59 = vrot.slane %v1932_v38, 1  ;;  %v5715_v60 = vsel %vm6387_vm1, %v2057_v30, %v2058_v50  ;;  %vm6412_vm2 = vmmov %vm6387_vm1  ;;  %v6511_v20 = vld [vmem:[#allocation32_spill] sm:$0xff] }
 0x181   :  { %v1963_v39 = vrot.slane %v1931_v7, 7  ;;  %v2059_v9 = vrot.slane %v1931_v7, 1  ;;  %v1901_v33 = vadd.f32 %v5521_v61, %v1775_v62  ;;  %4153 = vmatprep.mubr.msk.f32.mxu1 %vm6256_vm3, %v1931_v7  ;;  %6410 = vst [vmem:[#allocation36_spill] sm:$0xff] %v5715_v60 }
 0x182   :  { %v1934_v24 = vmax.f32 %v1902_v4, 0.0  ;;  %4154 = vmatmul.mubr.msk.f32.gmra.mrb[16].mxu1 %vm6256_vm3, %v1932_v38 }
 0x183   :  { %v1933_v12 = vmax.f32 %v1901_v33, 0.0  ;;  %v4097_v58 = vpop.f32.mrb[20].mxu0  ;;  %v5719_v11 = vsel %vm6390_vm4, %v1962_v19, %v1963_v39  ;;  %v5723_v44 = vsel %vm6411_vm5, %v1963_v39, %v1964_v10  ;;  %v5727_v7 = vsel %vm6412_vm2, %v2058_v50, %v2059_v9  ;;  %vm6415_vm5 = vmmov %vm6390_vm4 }
 0x184   :  { %6413 = vst [vmem:[#allocation37_spill] sm:$0xff] %v5727_v7  ;;  %v1966_v4 = vrot.slane %v1934_v24, 7  ;;  %v1904_v38 = vadd.f32 %v4097_v58, %v5521_v61  ;;  %v1785_v62 = vpop.f32.mrb[21].mxu0  ;;  %v2062_v19 = vrot.slane %v1934_v24, 1  ;;  %v5735_v39 = vsel %vm6387_vm1, %v2059_v9, %v2060_v59  ;;  %vm6416_vm2 = vmmov %vm6387_vm1 }
 0x185   :  { %v1965_v30 = vrot.slane %v1933_v12, 7  ;;  %v2061_v60 = vrot.slane %v1933_v12, 1  ;;  %v1903_v33 = vadd.f32 %v5521_v61, %v1785_v62  ;;  %4156 = vmatprep.mubr.msk.f32.mxu1 %vm6256_vm3, %v1933_v12  ;;  %6414 = vst [vmem:[#allocation38_spill] sm:$0xff] %v5735_v39  ;;  %v2027_v3 = vsel %vm5208_vm14, 0.0, %v5719_v11  ;;  %v6514_v11 = vld [vmem:[#allocation29_spill] sm:$0xff] }
 0x186   :  { %v1936_v56 = vmax.f32 %v1904_v38, 0.0  ;;  %4157 = vmatmul.mubr.msk.f32.gmra.mrb[18].mxu1 %vm6256_vm3, %v1934_v24 }
 0x187   :  { %v1935_v50 = vmax.f32 %v1903_v33, 0.0  ;;  %v4100_v7 = vpop.f32.mrb[22].mxu0  ;;  %v5739_v58 = vsel %vm6390_vm4, %v1964_v10, %v1965_v30  ;;  %v5743_v0 = vsel %vm6415_vm5, %v1965_v30, %v1966_v4  ;;  %v5747_v12 = vsel %vm6416_vm2, %v2060_v59, %v2061_v60  ;;  %vm6419_vm5 = vmmov %vm6390_vm4 }
 0x188   :  { %6417 = vst [vmem:[#allocation39_spill] sm:$0xff] %v5747_v12  ;;  %v1968_v38 = vrot.slane %v1936_v56, 7  ;;  %v1906_v24 = vadd.f32 %v4100_v7, %v5521_v61  ;;  %v1795_v62 = vpop.f32.mrb[23].mxu0  ;;  %v2064_v10 = vrot.slane %v1936_v56, 1  ;;  %v5755_v30 = vsel %vm6387_vm1, %v2061_v60, %v2062_v19  ;;  %vm6420_vm2 = vmmov %vm6387_vm1 }
 0x189   :  { %v1967_v9 = vrot.slane %v1935_v50, 7  ;;  %v2063_v39 = vrot.slane %v1935_v50, 1  ;;  %v1905_v33 = vadd.f32 %v5521_v61, %v1795_v62  ;;  %4159 = vmatprep.mubr.msk.f32.mxu1 %vm6256_vm3, %v1935_v50  ;;  %6418 = vst [vmem:[#allocation40_spill] sm:$0xff] %v5755_v30  ;;  %v2029_v15 = vsel %vm5223_vm15, 0.0, %v5739_v58 }
 0x18a   :  { %v1938_v40 = vmax.f32 %v1906_v24, 0.0  ;;  %4160 = vmatmul.mubr.msk.f32.gmra.mrb[20].mxu1 %vm6256_vm3, %v1936_v56 }
 0x18b   :  { %v1937_v59 = vmax.f32 %v1905_v33, 0.0  ;;  %v4103_v12 = vpop.f32.mrb[24].mxu0  ;;  %v5759_v7 = vsel %vm6390_vm4, %v1966_v4, %v1967_v9  ;;  %v5763_v48 = vsel %vm6419_vm5, %v1967_v9, %v1968_v38  ;;  %v5767_v50 = vsel %vm6420_vm2, %v2062_v19, %v2063_v39  ;;  %vm6423_vm5 = vmmov %vm6390_vm4 }
 0x18c   :  { %6421 = vst [vmem:[#allocation41_spill] sm:$0xff] %v5767_v50  ;;  %v1970_v24 = vrot.slane %v1938_v40, 7  ;;  %v1908_v56 = vadd.f32 %v4103_v12, %v5521_v61  ;;  %v1805_v62 = vpop.f32.mrb[25].mxu0  ;;  %v2066_v4 = vrot.slane %v1938_v40, 1  ;;  %v5775_v9 = vsel %vm6387_vm1, %v2063_v39, %v2064_v10  ;;  %vm6424_vm2 = vmmov %vm6387_vm1 }
 0x18d   :  { %v1969_v60 = vrot.slane %v1937_v59, 7  ;;  %v2065_v30 = vrot.slane %v1937_v59, 1  ;;  %v1907_v33 = vadd.f32 %v5521_v61, %v1805_v62  ;;  %4162 = vmatprep.mubr.msk.f32.mxu1 %vm6256_vm3, %v1937_v59  ;;  %6422 = vst [vmem:[#allocation42_spill] sm:$0xff] %v5775_v9  ;;  %v2031_v28 = vsel %vm5238_vm0, 0.0, %v5759_v7  ;;  %v6517_v7 = vld [vmem:[#allocation34_spill] sm:$0xff] }
 0x18e   :  { %v1940_v16 = vmax.f32 %v1908_v56, 0.0  ;;  %4163 = vmatmul.mubr.msk.f32.gmra.mrb[22].mxu1 %vm6256_vm3, %v1938_v40 }
 0x18f   :  { %v1939_v19 = vmax.f32 %v1907_v33, 0.0  ;;  %v4106_v50 = vpop.f32.mrb[26].mxu0  ;;  %v5779_v12 = vsel %vm6390_vm4, %v1968_v38, %v1969_v60  ;;  %v5783_v45 = vsel %vm6423_vm5, %v1969_v60, %v1970_v24  ;;  %v5787_v59 = vsel %vm6424_vm2, %v2064_v10, %v2065_v30  ;;  %vm6427_vm5 = vmmov %vm6390_vm4 }
 0x190   :  { %6425 = vst [vmem:[#allocation43_spill] sm:$0xff] %v5787_v59  ;;  %v1972_v56 = vrot.slane %v1940_v16, 7  ;;  %v1910_v40 = vadd.f32 %v4106_v50, %v5521_v61  ;;  %v1815_v62 = vpop.f32.mrb[27].mxu0  ;;  %v2068_v38 = vrot.slane %v1940_v16, 1  ;;  %v5795_v60 = vsel %vm6387_vm1, %v2065_v30, %v2066_v4  ;;  %vm6428_vm2 = vmmov %vm6387_vm1 }
 0x191   :  { %v1971_v39 = vrot.slane %v1939_v19, 7  ;;  %v2067_v9 = vrot.slane %v1939_v19, 1  ;;  %v1909_v33 = vadd.f32 %v5521_v61, %v1815_v62  ;;  %4165 = vmatprep.mubr.msk.f32.mxu1 %vm6256_vm3, %v1939_v19  ;;  %6426 = vst [vmem:[#allocation44_spill] sm:$0xff] %v5795_v60 }
 0x192   :  { %v1942_v37 = vmax.f32 %v1910_v40, 0.0  ;;  %4166 = vmatmul.mubr.msk.f32.gmra.mrb[24].mxu1 %vm6256_vm3, %v1940_v16 }
 0x193   :  { %v1941_v10 = vmax.f32 %v1909_v33, 0.0  ;;  %v4109_v59 = vpop.f32.mrb[28].mxu0  ;;  %v5799_v50 = vsel %vm6390_vm4, %v1970_v24, %v1971_v39  ;;  %v5803_v46 = vsel %vm6427_vm5, %v1971_v39, %v1972_v56  ;;  %v5807_v19 = vsel %vm6428_vm2, %v2066_v4, %v2067_v9  ;;  %vm6431_vm5 = vmmov %vm6390_vm4 }
 0x194   :  { %6429 = vst [vmem:[#allocation45_spill] sm:$0xff] %v5807_v19  ;;  %v1974_v40 = vrot.slane %v1942_v37, 7  ;;  %v1912_v16 = vadd.f32 %v4109_v59, %v5521_v61  ;;  %v1825_v62 = vpop.f32.mrb[29].mxu0  ;;  %v2070_v24 = vrot.slane %v1942_v37, 1  ;;  %v5815_v39 = vsel %vm6387_vm1, %v2067_v9, %v2068_v38  ;;  %vm6432_vm2 = vmmov %vm6387_vm1 }
 0x195   :  { %v1973_v30 = vrot.slane %v1941_v10, 7  ;;  %v2069_v60 = vrot.slane %v1941_v10, 1  ;;  %v1911_v33 = vadd.f32 %v5521_v61, %v1825_v62  ;;  %4168 = vmatprep.mubr.msk.f32.mxu1 %vm6256_vm3, %v1941_v10  ;;  %6430 = vst [vmem:[#allocation46_spill] sm:$0xff] %v5815_v39 }
 0x196   :  { %v1944_v49 = vmax.f32 %v1912_v16, 0.0  ;;  %4169 = vmatmul.mubr.msk.f32.gmra.mrb[26].mxu1 %vm6256_vm3, %v1942_v37 }
 0x197   :  { %v1943_v4 = vmax.f32 %v1911_v33, 0.0  ;;  %v4112_v19 = vpop.f32.mrb[30].mxu0  ;;  %v5819_v59 = vsel %vm6390_vm4, %v1972_v56, %v1973_v30  ;;  %v5823_v1 = vsel %vm6431_vm5, %v1973_v30, %v1974_v40  ;;  %v5827_v10 = vsel %vm6432_vm2, %v2068_v38, %v2069_v60  ;;  %vm6435_vm5 = vmmov %vm6390_vm4 }
 0x198   :  { %6433 = vst [vmem:[#allocation47_spill] sm:$0xff] %v5827_v10  ;;  %v1976_v16 = vrot.slane %v1944_v49, 7  ;;  %v1914_v37 = vadd.f32 %v4112_v19, %v5521_v61  ;;  %v1835_v62 = vpop.f32.mrb[31].mxu0  ;;  %v2072_v9 = vrot.slane %v1944_v49, 1  ;;  %v5835_v30 = vsel %vm6387_vm1, %v2069_v60, %v2070_v24  ;;  %vm6436_vm2 = vmmov %vm6387_vm1  ;;  %v3678_v60 = vld [vmem:[%s6208_s3 + $0x98] sm:$0xff] }
 0x199   :  { %v1975_v39 = vrot.slane %v1943_v4, 7  ;;  %v2071_v33 = vrot.slane %v1943_v4, 1  ;;  %v1913_v13 = vadd.f32 %v5521_v61, %v1835_v62  ;;  %4171 = vmatprep.mubr.msk.f32.mxu1 %vm6256_vm3, %v1943_v4  ;;  %6434 = vst [vmem:[#allocation48_spill] sm:$0xff] %v5835_v30  ;;  %v3680_v30 = vld [vmem:[%s6208_s3 + $0xa8] sm:$0xff] }
 0x19a   :  { %v1946_v56 = vmax.f32 %v1914_v37, 0.0  ;;  %4172 = vmatmul.mubr.msk.f32.gmra.mrb[28].mxu1 %vm6256_vm3, %v1944_v49 }
 0x19b   :  { %v1945_v38 = vmax.f32 %v1913_v13, 0.0  ;;  %v5839_v10 = vsel %vm6390_vm4, %v1974_v40, %v1975_v39  ;;  %v5843_v19 = vsel %vm6435_vm5, %v1975_v39, %v1976_v16  ;;  %v5847_v61 = vsel %vm6436_vm2, %v2070_v24, %v2071_v33  ;;  %v3677_v13 = vld [vmem:[%s6208_s3 + $0x90] sm:$0xff]  ;;  %vm6440_vm5 = vmmov %vm6387_vm1 }
 0x19c   :  { %6437 = vst [vmem:[#allocation49_spill] sm:$0xff] %v5847_v61  ;;  %v1978_v4 = vrot.slane %v1946_v56, 7  ;;  %v2074_v37 = vrot.slane %v1946_v56, 1  ;;  %v5858_v40 = vsel %vm6387_vm1, %v2071_v33, %v2072_v9  ;;  %v6438_v24 = vrot.slane %v5531_v52, 7  ;;  %vm6442_vm2 = vmmov %vm6390_vm4 }
 0x19d   :  { %v1977_v49 = vrot.slane %v1945_v38, 7  ;;  %v2073_v62 = vrot.slane %v1945_v38, 1  ;;  %4174 = vmatprep.mubr.msk.f32.mxu1 %vm6256_vm3, %v1945_v38  ;;  %v6439_v38 = vrot.slane %v5531_v52, 1  ;;  %vm6443_vm1 = vmmov %vm6442_vm2  ;;  %v4394_v52 = vpack.c.bf16 %v3678_v60, %v3677_v13  ;;  %v6531_v13 = vld [vmem:[#allocation39_spill] sm:$0xff] }
 0x19e   :  { %4175 = vmatmul.mubr.msk.f32.gmra.mrb[30].mxu1 %vm6256_vm3, %v1946_v56  ;;  %v2010_v39 = vsel %vm6390_vm4, %v1978_v4, %v6438_v24  ;;  %vm6444_vm3 = vmmov %vm6440_vm5  ;;  %vm6445_vm4 = vcmask 523264   ;;  %v6532_v60 = vld [vmem:[#allocation7_spill] sm:$0xff] }
 0x19f   :  { %v5869_v61 = vsel %vm6440_vm5, %v2074_v37, %v6439_v38  ;;  %v2011_v34 = vsel %vm5043_vm6, 0.0, %v2010_v39  ;;  %v5875_v33 = vsel %vm6442_vm2, %v1976_v16, %v1977_v49  ;;  %v5879_v56 = vsel %vm6443_vm1, %v1977_v49, %v1978_v4  ;;  %vm6446_vm5 = vmmov %vm6444_vm3  ;;  %v3679_v16 = vld [vmem:[%s6208_s3 + $0xa0] sm:$0xff]  ;;  %v3682_v4 = vld [vmem:[%s6208_s3 + $0xb8] sm:$0xff] }
 0x1a0   :  { %v5883_v24 = vsel %vm6444_vm3, %v2072_v9, %v2073_v62  ;;  %4193 = vmatprep.mubr.msk.f32.mxu1 %vm6445_vm4, %v2011_v34  ;;  %v5888_v38 = vsel %vm6446_vm5, %v2073_v62, %v2074_v37  ;;  %vm6447_vm6 = vmmov %vm6445_vm4  ;;  %v2013_v34 = vsel %vm5081_vm7, 0.0, %v5570_v51  ;;  %v4398_v35 = vpack.c.bf16 %v3680_v30, %v3679_v16  ;;  %v3681_v9 = vld [vmem:[%s6208_s3 + $0xb0] sm:$0xff]  ;;  %v6526_v37 = vld [vmem:[#allocation6_spill] sm:$0xff] }
 0x1a1   :  { %vm6448_vm3 = vmmov %vm6445_vm4  ;;  %v2017_v51 = vsel %vm5133_vm9, 0.0, %v5618_v55  ;;  %v6502_v55 = vld [vmem:[#allocation27_spill] sm:$0xff]  ;;  %v6529_v62 = vld [vmem:[#allocation38_spill] sm:$0xff] }
 0x1a2   :  { %4194 = vmatmul.mubr.msk.f32.vlgmr.msra.gmra.mrb[0].mxu1 %vm6447_vm6, %v5550_v32  ;;  %vm6449_vm2 = vmmov %vm6448_vm3  ;;  %v4402_v32 = vpack.c.bf16 %v3682_v4, %v3681_v9  ;;  %v6540_v30 = vld [vmem:[#allocation42_spill] sm:$0xff]  ;;  %v6546_v4 = vld [vmem:[#allocation44_spill] sm:$0xff] }
 0x1a3   :  { %4196 = vmatprep.mubr.msk.f32.mxu1 %vm6448_vm3, %v2013_v34  ;;  %4393 = vmatpush3.bf16.msra.mxu1 %v5607_v63  ;;  %vm6450_vm7 = vmmov %vm6449_vm2  ;;  %v6499_v63 = vld [vmem:[#allocation22_spill] sm:$0xff]  ;;  %v6542_v34 = vld [vmem:[#allocation43_spill] sm:$0xff] }
 0x1a4   :  { %4395 = vmatprep.subr.bf16.mxu1 %v4394_v52  ;;  %vm6451_vm1 = vmmov %vm6449_vm2 }
 0x1a5   :  { %vm6452_vm4 = vmmov %vm6451_vm1 }
 0x1a6   :  { %4197 = vmatmul.mubr.msk.f32.gmra.mrb[2].mxu1 %vm6449_vm2, %v5574_v25  ;;  %vm6453_vm5 = vmmov %vm6451_vm1  ;;  %v6494_v25 = vld [vmem:[#allocation20_spill] sm:$0xff] }
 0x1a7   :  { %4199 = vmatprep.mubr.msk.f32.mxu1 %vm6450_vm7, %v2015_v53  ;;  %4397 = vmatpush3.bf16.msra.mxu1 %v4394_v52  ;;  %vm6454_vm8 = vmmov %vm6451_vm1  ;;  %v6537_v52 = vld [vmem:[#allocation8_spill] sm:$0xff]  ;;  %v6548_v53 = vld [vmem:[#allocation45_spill] sm:$0xff] }
 0x1a8   :  { %4399 = vmatprep.subr.bf16.mxu1 %v4398_v35  ;;  %vm6455_vm6 = vmmov %vm6451_vm1 }
 0x1a9   :  { %vm6456_vm9 = vmmov %vm6451_vm1 }
 0x1aa   :  { %4200 = vmatmul.mubr.msk.f32.gmra.mrb[4].mxu1 %vm6451_vm1, %v5600_v41  ;;  %vm6457_vm3 = vmmov %vm6451_vm1  ;;  %v6496_v41 = vld [vmem:[#allocation26_spill] sm:$0xff] }
 0x1ab   :  { %4202 = vmatprep.mubr.msk.f32.mxu1 %vm6452_vm4, %v2017_v51  ;;  %4401 = vmatpush3.bf16.msra.mxu1 %v4398_v35  ;;  %vm6458_vm10 = vmmov %vm6451_vm1  ;;  %v6543_v35 = vld [vmem:[#allocation9_spill] sm:$0xff] }
 0x1ac   :  { %4403 = vmatprep.subr.bf16.mxu1 %v4402_v32  ;;  %vm6459_vm2 = vmmov %vm6451_vm1 }
 0x1ad   :  { %vm6460_vm7 = vmmov %vm6451_vm1 }
 0x1ae   :  { %4203 = vmatmul.mubr.msk.f32.gmra.mrb[6].mxu1 %vm6453_vm5, %v5622_v57  ;;  %vm6461_vm11 = vmmov %vm6451_vm1 }
 0x1af   :  { %4205 = vmatprep.mubr.msk.f32.mxu1 %vm6454_vm8, %v2019_v42  ;;  %4405 = vmatpush3.bf16.msra.mxu1 %v4402_v32  ;;  %vm6462_vm12 = vmmov %vm6451_vm1  ;;  %vm6467_vm8 = vnez %v6303_v18  ;;  %v6549_v32 = vld [vmem:[#allocation10_spill] sm:$0xff] }
 0x1b0   :  { %vm6463_vm4 = vmmov %vm6451_vm1  ;;  %v2033_v14 = vsel %vm6467_vm8, 0.0, %v5779_v12  ;;  %v6519_v12 = vld [vmem:[#allocation35_spill] sm:$0xff]  ;;  %v6552_v42 = vld [vmem:[#allocation46_spill] sm:$0xff] }
 0x1b1   :  { %vm6465_vm5 = vmmov %vm6451_vm1 }
 0x1b2   :  { %4206 = vmatmul.mubr.msk.f32.gmra.mrb[8].mxu1 %vm6455_vm6, %v5643_v8  ;;  %v2025_v8 = vsel %vm5193_vm13, 0.0, %v5699_v27  ;;  %vm6464_vm13 = vmmov %vm6451_vm1  ;;  %v6513_v27 = vld [vmem:[#allocation33_spill] sm:$0xff] }
 0x1b3   :  { %4208 = vmatprep.mubr.msk.f32.mxu1 %vm6456_vm9, %v2021_v6  ;;  %vm6466_vm14 = vmmov %vm6451_vm1  ;;  %vm6470_vm9 = vnez %v6305_v36  ;;  %v6554_v6 = vld [vmem:[#allocation47_spill] sm:$0xff] }
 0x1b4   :  { %vm6468_vm6 = vmmov %vm6451_vm1  ;;  %v2035_v2 = vsel %vm6470_vm9, 0.0, %v5799_v50  ;;  %v6520_v50 = vld [vmem:[#allocation5_spill] sm:$0xff] }
 0x1b5   :  { %vm6469_vm15 = vmmov %vm6451_vm1 }
 0x1b6   :  { %4209 = vmatmul.mubr.msk.f32.gmra.mrb[10].mxu1 %vm6457_vm3, %v5663_v26  ;;  %vm6471_vm3 = vmmov %vm6451_vm1 }
 0x1b7   :  { %4211 = vmatprep.mubr.msk.f32.mxu1 %vm6458_vm10, %v2023_v43  ;;  %vm6472_vm0 = vmmov %vm6451_vm1  ;;  %vm6473_vm10 = vnez %v6307_v29  ;;  %v6482_v29 = vld [vmem:[#allocation15_spill] sm:$0xff] }
 0x1b8   :  { %v2037_v5 = vsel %vm6473_vm10, 0.0, %v5819_v59  ;;  %vm6497_vm10 = vnez %v6496_v41  ;;  %v6555_v43 = vld [vmem:[#allocation11_spill] sm:$0xff] }
 0x1ba   :  { %4212 = vmatmul.mubr.msk.f32.gmra.mrb[12].mxu1 %vm6459_vm2, %v5683_v17  ;;  %vm6474_vm2 = vmmov %vm6472_vm0  ;;  %v6490_v17 = vld [vmem:[#allocation18_spill] sm:$0xff] }
 0x1bb   :  { %4214 = vmatprep.mubr.msk.f32.mxu1 %vm6460_vm7, %v2025_v8  ;;  %vm6475_vm7 = vmmov %vm6472_vm0 }
 0x1be   :  { %4215 = vmatmul.mubr.msk.f32.gmra.mrb[14].mxu1 %vm6461_vm11, %v5703_v31  ;;  %vm6476_vm11 = vnez %v6309_v22  ;;  %v6485_v22 = vld [vmem:[#allocation24_spill] sm:$0xff]  ;;  %v6488_v31 = vld [vmem:[#allocation17_spill] sm:$0xff] }
 0x1bf   :  { %4217 = vmatprep.mubr.msk.f32.mxu1 %vm6451_vm1, %v2027_v3  ;;  %v2039_v18 = vsel %vm6476_vm11, 0.0, %v5839_v10  ;;  %vm6477_vm1 = vmmov %vm6472_vm0  ;;  %vm6486_vm8 = vnez %v6485_v22  ;;  %vm6503_vm11 = vnez %v6502_v55  ;;  %v6523_v10 = vld [vmem:[#allocation36_spill] sm:$0xff]  ;;  %v3348_v22 = vld [vmem:[%s6210_s5 + $0x20] sm:$0xff] }
 0x1c0   :  { %v6558_v3 = vld [vmem:[#allocation48_spill] sm:$0xff]  ;;  %v3356_v55 = vld [vmem:[%s6210_s5 + $0x60] sm:$0xff] }
 0x1c2   :  { %4218 = vmatmul.mubr.msk.f32.gmra.mrb[16].mxu1 %vm6462_vm12, %v5723_v44  ;;  %vm6478_vm12 = vmmov %vm6472_vm0  ;;  %v6508_v44 = vld [vmem:[#allocation28_spill] sm:$0xff] }
 0x1c3   :  { %4220 = vmatprep.mubr.msk.f32.mxu1 %vm6463_vm4, %v2029_v15  ;;  %vm6479_vm4 = vnez %v6311_v21  ;;  %v6491_v21 = vld [vmem:[#allocation25_spill] sm:$0xff] }
 0x1c4   :  { %v2041_v36 = vsel %vm6479_vm4, 0.0, %v5875_v33  ;;  %vm6492_vm9 = vnez %v6491_v21  ;;  %vm6509_vm4 = vnez %v6508_v44  ;;  %v6535_v33 = vld [vmem:[#allocation40_spill] sm:$0xff]  ;;  %v6560_v15 = vld [vmem:[#allocation49_spill] sm:$0xff]  ;;  %v3351_v21 = vld [vmem:[%s6210_s5 + $0x38] sm:$0xff] }
 0x1c5   :  { %v2110_v26 = vsel %vm6492_vm9, 0.0, %v6490_v17  ;;  %vm6522_vm9 = vmmov %vm6472_vm0  ;;  %v3350_v17 = vld [vmem:[%s6210_s5 + $0x30] sm:$0xff]  ;;  %v3359_v44 = vld [vmem:[%s6210_s5 + $0x78] sm:$0xff] }
 0x1c6   :  { %4221 = vmatmul.mubr.msk.f32.gmra.mrb[18].mxu1 %vm6464_vm13, %v5743_v0  ;;  %vm6480_vm13 = vmmov %vm6472_vm0  ;;  %v6507_v0 = vld [vmem:[#allocation31_spill] sm:$0xff] }
 0x1c7   :  { %4223 = vmatprep.mubr.msk.f32.mxu1 %vm6465_vm5, %v2031_v28  ;;  %vm6481_vm5 = vmmov %vm6472_vm0  ;;  %v2116_v47 = vsel %vm6509_vm4, 0.0, %v6507_v0  ;;  %v6561_v28 = vld [vmem:[#allocation12_spill] sm:$0xff]  ;;  %v3358_v0 = vld [vmem:[%s6210_s5 + $0x70] sm:$0xff] }
 0x1ca   :  { %4224 = vmatmul.mubr.msk.f32.gmra.mrb[20].mxu1 %vm6466_vm14, %v5763_v48  ;;  %vm6483_vm14 = vmmov %vm6472_vm0 }
 0x1cb   :  { %4226 = vmatprep.mubr.msk.f32.mxu1 %vm6468_vm6, %v2033_v14  ;;  %vm6487_vm6 = vmmov %vm6472_vm0 }
 0x1ce   :  { %4227 = vmatmul.mubr.msk.f32.gmra.mrb[22].mxu1 %vm6469_vm15, %v5783_v45  ;;  %vm6489_vm15 = vmmov %vm6472_vm0  ;;  %v6501_v45 = vld [vmem:[#allocation23_spill] sm:$0xff] }
 0x1cf   :  { %4229 = vmatprep.mubr.msk.f32.mxu1 %vm6471_vm3, %v2035_v2  ;;  %vm6493_vm3 = vmmov %vm6472_vm0  ;;  %v2114_v57 = vsel %vm6503_vm11, 0.0, %v6501_v45  ;;  %v6565_v2 = vld [vmem:[#allocation13_spill] sm:$0xff] }
 0x1d2   :  { %4230 = vmatmul.mubr.msk.f32.gmra.mrb[24].mxu1 %vm6472_vm0, %v5803_v46  ;;  %v2112_v46 = vsel %vm6497_vm10, 0.0, %v6495_v54  ;;  %v3353_v54 = vld [vmem:[%s6210_s5 + $0x48] sm:$0xff] }
 0x1d3   :  { %4232 = vmatprep.mubr.msk.f32.mxu1 %vm6474_vm2, %v2037_v5  ;;  %vm6498_vm2 = vmmov %vm6472_vm0 }
 0x1d6   :  { %4233 = vmatmul.mubr.msk.f32.gmra.mrb[26].mxu1 %vm6475_vm7, %v5823_v1  ;;  %v6484_v1 = vld [vmem:[#allocation16_spill] sm:$0xff]  ;;  %vm6500_vm7 = vmmov %vm6472_vm0 }
 0x1d7   :  { %4235 = vmatprep.mubr.msk.f32.mxu1 %vm6477_vm1, %v2039_v18  ;;  %v2108_v48 = vsel %vm6486_vm8, 0.0, %v6484_v1  ;;  %vm6504_vm1 = vmmov %vm6472_vm0  ;;  %v6569_v18 = vld [vmem:[#allocation14_spill] sm:$0xff] }
 0x1d8   :  { %vm6516_vm8 = vmmov %vm6472_vm0 }
 0x1d9   :  { %vm6528_vm10 = vmmov %vm6504_vm1 }
 0x1da   :  { %4236 = vmatmul.mubr.msk.f32.gmra.mrb[28].mxu1 %vm6478_vm12, %v5843_v19  ;;  %vm6506_vm12 = vmmov %vm6472_vm0  ;;  %v6525_v19 = vld [vmem:[#allocation37_spill] sm:$0xff] }
 0x1db   :  { %4238 = vmatprep.mubr.msk.f32.mxu1 %vm6480_vm13, %v2041_v36  ;;  %vm6510_vm13 = vmmov %vm6472_vm0 }
 0x1dc   :  { %vm6534_vm11 = vmmov %vm6504_vm1 }
 0x1dd   :  { %vm6539_vm4 = vmmov %vm6504_vm1 }
 0x1de   :  { %4239 = vmatmul.mubr.msk.f32.gmra.mrb[30].mxu1 %vm6481_vm5, %v5879_v56  ;;  %vm6512_vm5 = vmmov %vm6472_vm0  ;;  %v6536_v56 = vld [vmem:[#allocation41_spill] sm:$0xff] }
 0x1df   :  { %4257 = vmatprep.mubr.msk.f32.mxu1 %vm6483_vm14, %v6482_v29  ;;  %vm6515_vm14 = vnez %v6514_v11  ;;  %v3344_v29 = vld [vmem:[%s6210_s5] sm:$0xff] }
 0x1e0   :  { %v2118_v58 = vsel %vm6515_vm14, 0.0, %v6513_v27  ;;  %vm6545_vm14 = vmmov %vm6504_vm1 }
 0x1e2   :  { %4258 = vmatmul.mubr.msk.f32.vlgmr.msra.gmra.mrb[0].mxu1 %vm6487_vm6, %v2108_v48  ;;  %vm6518_vm6 = vmmov %vm6472_vm0  ;;  %v3349_v48 = vld [vmem:[%s6210_s5 + $0x28] sm:$0xff] }
 0x1e3   :  { %4260 = vmatprep.mubr.msk.f32.mxu1 %vm6489_vm15, %v6488_v31  ;;  %vm6521_vm15 = vnez %v6520_v50  ;;  %v4414_v31 = vpack.c.bf16 %v3349_v48, %v3348_v22 }
 0x1e4   :  { %v2120_v59 = vsel %vm6521_vm15, 0.0, %v6519_v12  ;;  %vm6551_vm15 = vmmov %vm6504_vm1 }
 0x1e6   :  { %4261 = vmatmul.mubr.msk.f32.gmra.mrb[2].mxu1 %vm6493_vm3, %v2110_v26  ;;  %vm6524_vm3 = vmmov %vm6472_vm0  ;;  %v4418_v26 = vpack.c.bf16 %v3351_v21, %v3350_v17 }
 0x1e7   :  { %4263 = vmatprep.mubr.msk.f32.mxu1 %vm6472_vm0, %v6494_v25  ;;  %vm6527_vm0 = vnez %v6526_v37  ;;  %v3352_v25 = vld [vmem:[%s6210_s5 + $0x40] sm:$0xff] }
 0x1e8   :  { %v2122_v49 = vsel %vm6527_vm0, 0.0, %v6525_v19  ;;  %vm6557_vm0 = vmmov %vm6504_vm1  ;;  %v4422_v41 = vpack.c.bf16 %v3353_v54, %v3352_v25 }
 0x1ea   :  { %4264 = vmatmul.mubr.msk.f32.gmra.mrb[4].mxu1 %vm6498_vm2, %v2112_v46  ;;  %vm6530_vm2 = vmmov %vm6504_vm1  ;;  %v3354_v46 = vld [vmem:[%s6210_s5 + $0x50] sm:$0xff] }
 0x1eb   :  { %4266 = vmatprep.mubr.msk.f32.mxu1 %vm6500_vm7, %v6499_v63  ;;  %vm6533_vm7 = vnez %v6532_v60  ;;  %v3355_v63 = vld [vmem:[%s6210_s5 + $0x58] sm:$0xff] }
 0x1ec   :  { %v2124_v39 = vsel %vm6533_vm7, 0.0, %v6531_v13  ;;  %vm6563_vm7 = vmmov %vm6557_vm0  ;;  %v4426_v45 = vpack.c.bf16 %v3355_v63, %v3354_v46 }
 0x1ee   :  { %4267 = vmatmul.mubr.msk.f32.gmra.mrb[6].mxu1 %vm6504_vm1, %v2114_v57  ;;  %v3357_v57 = vld [vmem:[%s6210_s5 + $0x68] sm:$0xff] }
 0x1ef   :  { %4269 = vmatprep.mubr.msk.f32.mxu1 %vm6506_vm12, %v6505_v23  ;;  %vm6538_vm12 = vnez %v6537_v52  ;;  %v4430_v23 = vpack.c.bf16 %v3357_v57, %v3356_v55 }
 0x1f0   :  { %v2126_v16 = vsel %vm6538_vm12, 0.0, %v6536_v56  ;;  %vm6567_vm12 = vmmov %vm6557_vm0 }
 0x1f2   :  { %4270 = vmatmul.mubr.msk.f32.gmra.mrb[8].mxu1 %vm6510_vm13, %v2116_v47  ;;  %vm6541_vm13 = vmmov %vm6504_vm1  ;;  %v4434_v47 = vpack.c.bf16 %v3359_v44, %v3358_v0 }
 0x1f3   :  { %4272 = vmatprep.mubr.msk.f32.mxu1 %vm6512_vm5, %v6511_v20  ;;  %vm6544_vm5 = vnez %v6543_v35  ;;  %v6142_v20 = vld [vmem:[%s6209_s4] ss:$0 sm:$0xff] }
 0x1f4   :  { %v2128_v9 = vsel %vm6544_vm5, 0.0, %v6542_v34  ;;  %vm6571_vm5 = vmmov %vm6557_vm0 }
 0x1f6   :  { %4273 = vmatmul.mubr.msk.f32.gmra.mrb[10].mxu1 %vm6516_vm8, %v2118_v58  ;;  %vm6547_vm8 = vmmov %vm6504_vm1 }
 0x1f7   :  { %4275 = vmatprep.mubr.msk.f32.mxu1 %vm6518_vm6, %v6517_v7  ;;  %vm6550_vm6 = vnez %v6549_v32 }
 0x1f8   :  { %v2130_v51 = vsel %vm6550_vm6, 0.0, %v6548_v53  ;;  %vm3387_vm6 = vcmask 1043459  }
 0x1fa   :  { %4276 = vmatmul.mubr.msk.f32.gmra.mrb[12].mxu1 %vm6522_vm9, %v2120_v59  ;;  %vm6553_vm9 = vmmov %vm6504_vm1 }
 0x1fb   :  { %4278 = vmatprep.mubr.msk.f32.mxu1 %vm6524_vm3, %v6523_v10  ;;  %vm6556_vm3 = vnez %v6555_v43 }
 0x1fc   :  { %v2132_v8 = vsel %vm6556_vm3, 0.0, %v6554_v6  ;;  %vm3393_vm3 = vcmask 1046534  }
 0x1fe   :  { %4279 = vmatmul.mubr.msk.f32.gmra.mrb[14].mxu1 %vm6528_vm10, %v2122_v49  ;;  %vm6559_vm10 = vmmov %vm6557_vm0 }
 0x1ff   :  { %4281 = vmatprep.mubr.msk.f32.mxu1 %vm6530_vm2, %v6529_v62  ;;  %vm6562_vm2 = vnez %v6561_v28 }
 0x200   :  { %v2134_v14 = vsel %vm6562_vm2, 0.0, %v6560_v15 }
 0x202   :  { %4282 = vmatmul.mubr.msk.f32.gmra.mrb[16].mxu1 %vm6534_vm11, %v2124_v39  ;;  %vm6564_vm11 = vmmov %vm6557_vm0 }
 0x203   :  { %4284 = vmatprep.mubr.msk.f32.mxu1 %vm6504_vm1, %v6535_v33  ;;  %vm6566_vm1 = vnez %v6565_v2 }
 0x204   :  { %v2136_v5 = vsel %vm6566_vm1, 0.0, %v5883_v24 }
 0x206   :  { %4285 = vmatmul.mubr.msk.f32.gmra.mrb[18].mxu1 %vm6539_vm4, %v2126_v16  ;;  %vm6568_vm4 = vmmov %vm6557_vm0 }
 0x207   :  { %4287 = vmatprep.mubr.msk.f32.mxu1 %vm6541_vm13, %v6540_v30  ;;  %vm6570_vm13 = vnez %v6569_v18 }
 0x208   :  { %v2138_v36 = vsel %vm6570_vm13, 0.0, %v5869_v61  ;;  %v3347_v61 = vld [vmem:[%s6210_s5 + $0x18] sm:$0xff] }
 0x20a   :  { %4288 = vmatmul.mubr.msk.f32.gmra.mrb[20].mxu1 %vm6545_vm14, %v2128_v9  ;;  %vm3383_vm14 = vcmask 1041409  }
 0x20b   :  { %4290 = vmatprep.mubr.msk.f32.mxu1 %vm6547_vm8, %v6546_v4  ;;  %vm3385_vm8 = vcmask 1042434  }
 0x20e   :  { %4291 = vmatmul.mubr.msk.f32.gmra.mrb[22].mxu1 %vm6551_vm15, %v2130_v51  ;;  %vm3389_vm15 = vcmask 1044484  }
 0x20f   :  { %4293 = vmatprep.mubr.msk.f32.mxu1 %vm6553_vm9, %v6552_v42  ;;  %vm3391_vm9 = vcmask 1045509  }
 0x212   :  { %4294 = vmatmul.mubr.msk.f32.gmra.mrb[24].mxu1 %vm6557_vm0, %v2132_v8  ;;  %vm3395_vm0 = vcmask 1047559  }
 0x213   :  { %4296 = vmatprep.mubr.msk.f32.mxu1 %vm6559_vm10, %v6558_v3 }
 0x216   :  { %4297 = vmatmul.mubr.msk.f32.gmra.mrb[26].mxu1 %vm6563_vm7, %v2134_v14 }
 0x217   :  { %4299 = vmatprep.mubr.msk.f32.mxu1 %vm6564_vm11, %v5858_v40  ;;  %v3345_v40 = vld [vmem:[%s6210_s5 + $0x8] sm:$0xff] }
 0x218   :  { %v4406_v24 = vpack.c.bf16 %v3345_v40, %v3344_v29 }
 0x21a   :  { %4300 = vmatmul.mubr.msk.f32.gmra.mrb[28].mxu1 %vm6567_vm12, %v2136_v5  ;;  %4407 = vmatprep.subr.bf16.mxu0 %v4406_v24 }
 0x21b   :  { %4302 = vmatprep.mubr.msk.f32.mxu1 %vm6568_vm4, %v5888_v38  ;;  %4409 = vmatpush3.bf16.msra.mxu0 %v4406_v24  ;;  %v3346_v38 = vld [vmem:[%s6210_s5 + $0x10] sm:$0xff] }
 0x21c   :  { %v4410_v1 = vpack.c.bf16 %v3347_v61, %v3346_v38 }
 0x21e   :  { %4303 = vmatmul.mubr.msk.f32.gmra.mrb[30].mxu1 %vm6571_vm5, %v2138_v36  ;;  %4411 = vmatprep.subr.bf16.mxu0 %v4410_v1 }
 0x21f   :  { %4413 = vmatpush3.bf16.msra.mxu0 %v4410_v1 }
 0x220   :  { %4415 = vmatprep.subr.bf16.mxu0 %v4414_v31 }
 0x223   :  { %4417 = vmatpush3.bf16.msra.mxu0 %v4414_v31 }
 0x224   :  { %4419 = vmatprep.subr.bf16.mxu0 %v4418_v26 }
 0x227   :  { %4421 = vmatpush3.bf16.msra.mxu0 %v4418_v26 }
 0x228   :  { %4423 = vmatprep.subr.bf16.mxu0 %v4422_v41 }
 0x22b   :  { %4425 = vmatpush3.bf16.msra.mxu0 %v4422_v41 }
 0x22c   :  { %4427 = vmatprep.subr.bf16.mxu0 %v4426_v45 }
 0x22f   :  { %4429 = vmatpush3.bf16.msra.mxu0 %v4426_v45 }
 0x230   :  { %4431 = vmatprep.subr.bf16.mxu0 %v4430_v23 }
 0x233   :  { %4433 = vmatpush3.bf16.msra.mxu0 %v4430_v23 }
 0x234   :  { %4435 = vmatprep.subr.bf16.mxu0 %v4434_v47 }
 0x237   :  { %4437 = vmatpush3.bf16.msra.mxu0 %v4434_v47 }
 0x2b5   :  { %v4259_v27 = vpop.f32.mrb[0].mxu1 }
 0x2b6   :  { %v3169_v11 = vadd.f32 %v4259_v27, %v6142_v20  ;;  %v2970_v58 = vpop.f32.mrb[1].mxu1 }
 0x2b7   :  { %v3168_v7 = vadd.f32 %v6142_v20, %v2970_v58 }
 0x2b8   :  { %v3201_v12 = vmax.f32 %v3169_v11, 0.0 }
 0x2b9   :  { %v3200_v50 = vmax.f32 %v3168_v7, 0.0  ;;  %v4262_v59 = vpop.f32.mrb[2].mxu1 }
 0x2ba   :  { %v3171_v10 = vadd.f32 %v4262_v59, %v6142_v20  ;;  %v2980_v19 = vpop.f32.mrb[3].mxu1 }
 0x2bb   :  { %v3232_v37 = vmax.f32 %v3200_v50, %v3201_v12  ;;  %v3170_v49 = vadd.f32 %v6142_v20, %v2980_v19 }
 0x2bc   :  { %v3203_v62 = vmax.f32 %v3171_v10, 0.0 }
 0x2bd   :  { %v3233_v13 = vrot.slane %v3232_v37, 4  ;;  %v3202_v60 = vmax.f32 %v3170_v49, 0.0  ;;  %v4265_v39 = vpop.f32.mrb[4].mxu1 }
 0x2be   :  { %v3173_v33 = vadd.f32 %v4265_v39, %v6142_v20  ;;  %v2990_v56 = vpop.f32.mrb[5].mxu1 }
 0x2bf   :  { %v3234_v52 = vmax.f32 %v3232_v37, %v3233_v13  ;;  %v3239_v16 = vmax.f32 %v3202_v60, %v3203_v62  ;;  %v3172_v30 = vadd.f32 %v6142_v20, %v2990_v56 }
 0x2c0   :  { %v3205_v34 = vmax.f32 %v3173_v33, 0.0 }
 0x2c1   :  { %v3235_v35 = vrot.slane %v3234_v52, 2  ;;  %v3240_v9 = vrot.slane %v3239_v16, 4  ;;  %v3204_v4 = vmax.f32 %v3172_v30, 0.0  ;;  %v4268_v53 = vpop.f32.mrb[6].mxu1 }
 0x2c2   :  { %v3175_v32 = vadd.f32 %v4268_v53, %v6142_v20  ;;  %v3000_v51 = vpop.f32.mrb[7].mxu1 }
 0x2c3   :  { %v3236_v42 = vmax.f32 %v3234_v52, %v3235_v35  ;;  %v3241_v6 = vmax.f32 %v3239_v16, %v3240_v9  ;;  %v3246_v43 = vmax.f32 %v3204_v4, %v3205_v34  ;;  %v3174_v8 = vadd.f32 %v6142_v20, %v3000_v51 }
 0x2c4   :  { %v3207_v3 = vmax.f32 %v3175_v32, 0.0 }
 0x2c5   :  { %v3242_v15 = vrot.slane %v3241_v6, 2  ;;  %v3247_v28 = vrot.slane %v3246_v43, 4  ;;  %v3206_v14 = vmax.f32 %v3174_v8, 0.0  ;;  %v4271_v2 = vpop.f32.mrb[8].mxu1  ;;  %v3237_v5 = vrot.slane %v3236_v42, 1 }
 0x2c6   :  { %v3177_v18 = vadd.f32 %v4271_v2, %v6142_v20  ;;  %v3010_v36 = vpop.f32.mrb[9].mxu1 }
 0x2c7   :  { %v3243_v29 = vmax.f32 %v3241_v6, %v3242_v15  ;;  %v3248_v40 = vmax.f32 %v3246_v43, %v3247_v28  ;;  %v3253_v24 = vmax.f32 %v3206_v14, %v3207_v3  ;;  %v3176_v61 = vadd.f32 %v6142_v20, %v3010_v36 }
 0x2c8   :  { %v3209_v38 = vmax.f32 %v3177_v18, 0.0  ;;  %v3238_v17 = vmax.f32 %v3236_v42, %v3237_v5 }
 0x2c9   :  { %v3244_v1 = vrot.slane %v3243_v29, 1  ;;  %v3249_v22 = vrot.slane %v3248_v40, 2  ;;  %v3254_v48 = vrot.slane %v3253_v24, 4  ;;  %v4274_v31 = vpop.f32.mrb[10].mxu1  ;;  %v3208_v21 = vmax.f32 %v3176_v61, 0.0 }
 0x2ca   :  { %v3179_v26 = vadd.f32 %v4274_v31, %v6142_v20  ;;  %v3020_v25 = vpop.f32.mrb[11].mxu1 }
 0x2cb   :  { %v3245_v54 = vmax.f32 %v3243_v29, %v3244_v1  ;;  %v3250_v41 = vmax.f32 %v3248_v40, %v3249_v22  ;;  %v3255_v46 = vmax.f32 %v3253_v24, %v3254_v48  ;;  %v3178_v63 = vadd.f32 %v6142_v20, %v3020_v25 }
 0x2cc   :  { %v3260_v45 = vmax.f32 %v3208_v21, %v3209_v38  ;;  %v3211_v55 = vmax.f32 %v3179_v26, 0.0 }
 0x2cd   :  { %v3384_v57 = vsel %vm3383_vm14, %v3245_v54, %v3238_v17  ;;  %v3251_v23 = vrot.slane %v3250_v41, 1  ;;  %v3256_v0 = vrot.slane %v3255_v46, 2  ;;  %v3210_v44 = vmax.f32 %v3178_v63, 0.0  ;;  %v4277_v47 = vpop.f32.mrb[12].mxu1 }
 0x2ce   :  { %v3261_v27 = vrot.slane %v3260_v45, 4  ;;  %v3181_v11 = vadd.f32 %v4277_v47, %v6142_v20  ;;  %v3030_v58 = vpop.f32.mrb[13].mxu1 }
 0x2cf   :  { %v3252_v7 = vmax.f32 %v3250_v41, %v3251_v23  ;;  %v3257_v12 = vmax.f32 %v3255_v46, %v3256_v0  ;;  %v3267_v50 = vmax.f32 %v3210_v44, %v3211_v55  ;;  %v3180_v59 = vadd.f32 %v6142_v20, %v3030_v58 }
 0x2d0   :  { %v3262_v10 = vmax.f32 %v3260_v45, %v3261_v27  ;;  %v3213_v19 = vmax.f32 %v3181_v11, 0.0 }
 0x2d1   :  { %v3258_v37 = vrot.slane %v3257_v12, 1  ;;  %v3268_v49 = vrot.slane %v3267_v50, 4  ;;  %v3212_v62 = vmax.f32 %v3180_v59, 0.0  ;;  %v4280_v13 = vpop.f32.mrb[14].mxu1  ;;  %v3386_v60 = vsel %vm3385_vm8, %v3252_v7, %v3384_v57 }
 0x2d2   :  { %v3263_v39 = vrot.slane %v3262_v10, 2  ;;  %v3183_v33 = vadd.f32 %v4280_v13, %v6142_v20  ;;  %v3040_v56 = vpop.f32.mrb[15].mxu1 }
 0x2d3   :  { %v3259_v52 = vmax.f32 %v3257_v12, %v3258_v37  ;;  %v3269_v16 = vmax.f32 %v3267_v50, %v3268_v49  ;;  %v3274_v30 = vmax.f32 %v3212_v62, %v3213_v19  ;;  %v3182_v34 = vadd.f32 %v6142_v20, %v3040_v56 }
 0x2d4   :  { %v3264_v35 = vmax.f32 %v3262_v10, %v3263_v39  ;;  %v3215_v9 = vmax.f32 %v3183_v33, 0.0 }
 0x2d5   :  { %v3270_v4 = vrot.slane %v3269_v16, 2  ;;  %v3275_v53 = vrot.slane %v3274_v30, 4  ;;  %v3214_v32 = vmax.f32 %v3182_v34, 0.0  ;;  %v4283_v51 = vpop.f32.mrb[16].mxu1  ;;  %v3388_v42 = vsel %vm3387_vm6, %v3259_v52, %v3386_v60 }
 0x2d6   :  { %v3265_v6 = vrot.slane %v3264_v35, 1  ;;  %v3185_v43 = vadd.f32 %v4283_v51, %v6142_v20  ;;  %v3050_v8 = vpop.f32.mrb[17].mxu1 }
 0x2d7   :  { %v3271_v3 = vmax.f32 %v3269_v16, %v3270_v4  ;;  %v3276_v15 = vmax.f32 %v3274_v30, %v3275_v53  ;;  %v3281_v28 = vmax.f32 %v3214_v32, %v3215_v9  ;;  %v3184_v14 = vadd.f32 %v6142_v20, %v3050_v8 }
 0x2d8   :  { %v3266_v2 = vmax.f32 %v3264_v35, %v3265_v6  ;;  %v3217_v5 = vmax.f32 %v3185_v43, 0.0 }
 0x2d9   :  { %v3272_v18 = vrot.slane %v3271_v3, 1  ;;  %v3277_v36 = vrot.slane %v3276_v15, 2  ;;  %v3282_v29 = vrot.slane %v3281_v28, 4  ;;  %v3216_v40 = vmax.f32 %v3184_v14, 0.0  ;;  %v4286_v24 = vpop.f32.mrb[18].mxu1 }
 0x2da   :  { %v3187_v38 = vadd.f32 %v4286_v24, %v6142_v20  ;;  %v3060_v61 = vpop.f32.mrb[19].mxu1  ;;  %v3390_v1 = vsel %vm3389_vm15, %v3266_v2, %v3388_v42 }
 0x2db   :  { %v3273_v22 = vmax.f32 %v3271_v3, %v3272_v18  ;;  %v3278_v48 = vmax.f32 %v3276_v15, %v3277_v36  ;;  %v3283_v31 = vmax.f32 %v3281_v28, %v3282_v29  ;;  %v3288_v17 = vmax.f32 %v3216_v40, %v3217_v5 }
 0x2dc   :  { %v3219_v21 = vmax.f32 %v3187_v38, 0.0  ;;  %v3186_v26 = vadd.f32 %v6142_v20, %v3060_v61 }
 0x2dd   :  { %v3279_v25 = vrot.slane %v3278_v48, 1  ;;  %v3284_v54 = vrot.slane %v3283_v31, 2  ;;  %v3289_v41 = vrot.slane %v3288_v17, 4  ;;  %v4289_v46 = vpop.f32.mrb[20].mxu1  ;;  %v3392_v63 = vsel %vm3391_vm9, %v3273_v22, %v3390_v1 }
 0x2de   :  { %v3218_v45 = vmax.f32 %v3186_v26, 0.0  ;;  %v3189_v55 = vadd.f32 %v4289_v46, %v6142_v20  ;;  %v3070_v57 = vpop.f32.mrb[21].mxu1 }
 0x2df   :  { %v3285_v23 = vmax.f32 %v3283_v31, %v3284_v54  ;;  %v3290_v0 = vmax.f32 %v3288_v17, %v3289_v41  ;;  %v3188_v44 = vadd.f32 %v6142_v20, %v3070_v57  ;;  %v3280_v47 = vmax.f32 %v3278_v48, %v3279_v25 }
 0x2e0   :  { %v3295_v27 = vmax.f32 %v3218_v45, %v3219_v21  ;;  %v3221_v11 = vmax.f32 %v3189_v55, 0.0 }
 0x2e1   :  { %v3291_v58 = vrot.slane %v3290_v0, 2  ;;  %v3220_v7 = vmax.f32 %v3188_v44, 0.0  ;;  %v4292_v12 = vpop.f32.mrb[22].mxu1  ;;  %v3286_v50 = vrot.slane %v3285_v23, 1  ;;  %v3394_v59 = vsel %vm3393_vm3, %v3280_v47, %v3392_v63 }
 0x2e2   :  { %v3296_v10 = vrot.slane %v3295_v27, 4  ;;  %v3191_v19 = vadd.f32 %v4292_v12, %v6142_v20  ;;  %v3080_v37 = vpop.f32.mrb[23].mxu1 }
 0x2e3   :  { %v3302_v49 = vmax.f32 %v3220_v7, %v3221_v11  ;;  %v3190_v62 = vadd.f32 %v6142_v20, %v3080_v37  ;;  %v3287_v13 = vmax.f32 %v3285_v23, %v3286_v50  ;;  %v3292_v60 = vmax.f32 %v3290_v0, %v3291_v58 }
 0x2e4   :  { %v3297_v39 = vmax.f32 %v3295_v27, %v3296_v10  ;;  %v3223_v33 = vmax.f32 %v3191_v19, 0.0 }
 0x2e5   :  { %v3303_v56 = vrot.slane %v3302_v49, 4  ;;  %v3222_v52 = vmax.f32 %v3190_v62, 0.0  ;;  %v4295_v16 = vpop.f32.mrb[24].mxu1  ;;  %v3396_v30 = vsel %vm3395_vm0, %v3287_v13, %v3394_v59  ;;  %v3293_v51 = vrot.slane %v3292_v60, 1 }
 0x2e6   :  { %v3298_v34 = vrot.slane %v3297_v39, 2  ;;  %v3193_v35 = vadd.f32 %v4295_v16, %v6142_v20  ;;  %v3090_v9 = vpop.f32.mrb[25].mxu1  ;;  %4337 = vmatprep.mubr.f32.mxu0 %v3396_v30 }
 0x2e7   :  { %v3304_v4 = vmax.f32 %v3302_v49, %v3303_v56  ;;  %v3309_v53 = vmax.f32 %v3222_v52, %v3223_v33  ;;  %v3192_v32 = vadd.f32 %v6142_v20, %v3090_v9  ;;  %v3294_v40 = vmax.f32 %v3292_v60, %v3293_v51 }
 0x2e8   :  { %v3299_v42 = vmax.f32 %v3297_v39, %v3298_v34  ;;  %v3225_v6 = vmax.f32 %v3193_v35, 0.0 }
 0x2e9   :  { %v3305_v43 = vrot.slane %v3304_v4, 2  ;;  %v3310_v8 = vrot.slane %v3309_v53, 4  ;;  %v3224_v3 = vmax.f32 %v3192_v32, 0.0  ;;  %v4298_v15 = vpop.f32.mrb[26].mxu1 }
 0x2ea   :  { %v3300_v28 = vrot.slane %v3299_v42, 1  ;;  %v3195_v14 = vadd.f32 %v4298_v15, %v6142_v20  ;;  %v3100_v2 = vpop.f32.mrb[27].mxu1  ;;  %v3716_v15 = vld [vmem:[%s6211_s6] ss:$0 sm:$0xff] }
 0x2eb   :  { %v3306_v5 = vmax.f32 %v3304_v4, %v3305_v43  ;;  %v3311_v18 = vmax.f32 %v3309_v53, %v3310_v8  ;;  %v3316_v36 = vmax.f32 %v3224_v3, %v3225_v6  ;;  %v3194_v29 = vadd.f32 %v6142_v20, %v3100_v2 }
 0x2ec   :  { %v3301_v24 = vmax.f32 %v3299_v42, %v3300_v28  ;;  %v3227_v38 = vmax.f32 %v3195_v14, 0.0 }
 0x2ed   :  { %v3307_v61 = vrot.slane %v3306_v5, 1  ;;  %v3312_v1 = vrot.slane %v3311_v18, 2  ;;  %v3317_v22 = vrot.slane %v3316_v36, 4  ;;  %v3226_v48 = vmax.f32 %v3194_v29, 0.0  ;;  %v4301_v31 = vpop.f32.mrb[28].mxu1 }
 0x2ee   :  { %v3397_v17 = vsel %vm3383_vm14, %v3301_v24, %v3294_v40  ;;  %v3197_v21 = vadd.f32 %v4301_v31, %v6142_v20  ;;  %v3110_v26 = vpop.f32.mrb[29].mxu1 }
 0x2ef   :  { %v3308_v25 = vmax.f32 %v3306_v5, %v3307_v61  ;;  %v3313_v54 = vmax.f32 %v3311_v18, %v3312_v1  ;;  %v3318_v41 = vmax.f32 %v3316_v36, %v3317_v22  ;;  %v3323_v46 = vmax.f32 %v3226_v48, %v3227_v38 }
 0x2f0   :  { %v3229_v63 = vmax.f32 %v3197_v21, 0.0  ;;  %v3196_v45 = vadd.f32 %v6142_v20, %v3110_v26 }
 0x2f1   :  { %v3398_v55 = vsel %vm3385_vm8, %v3308_v25, %v3397_v17  ;;  %v3314_v57 = vrot.slane %v3313_v54, 1  ;;  %v3319_v23 = vrot.slane %v3318_v41, 2  ;;  %v3324_v0 = vrot.slane %v3323_v46, 4  ;;  %v4304_v44 = vpop.f32.mrb[30].mxu1 }
 0x2f2   :  { %v3228_v47 = vmax.f32 %v3196_v45, 0.0  ;;  %v3199_v27 = vadd.f32 %v4304_v44, %v6142_v20  ;;  %v3120_v11 = vpop.f32.mrb[31].mxu1 }
 0x2f3   :  { %v3315_v58 = vmax.f32 %v3313_v54, %v3314_v57  ;;  %v3320_v7 = vmax.f32 %v3318_v41, %v3319_v23  ;;  %v3325_v12 = vmax.f32 %v3323_v46, %v3324_v0  ;;  %v3198_v50 = vadd.f32 %v6142_v20, %v3120_v11 }
 0x2f4   :  { %v3330_v59 = vmax.f32 %v3228_v47, %v3229_v63  ;;  %v3231_v10 = vmax.f32 %v3199_v27, 0.0 }
 0x2f5   :  { %v3321_v19 = vrot.slane %v3320_v7, 1  ;;  %v3326_v37 = vrot.slane %v3325_v12, 2  ;;  %v3230_v49 = vmax.f32 %v3198_v50, 0.0  ;;  %v3399_v62 = vsel %vm3387_vm6, %v3315_v58, %v3398_v55 }
 0x2f6   :  { %v3331_v13 = vrot.slane %v3330_v59, 4 }
 0x2f7   :  { %v3322_v60 = vmax.f32 %v3320_v7, %v3321_v19  ;;  %v3327_v39 = vmax.f32 %v3325_v12, %v3326_v37  ;;  %v3337_v33 = vmax.f32 %v3230_v49, %v3231_v10 }
 0x2f8   :  { %v3332_v56 = vmax.f32 %v3330_v59, %v3331_v13 }
 0x2f9   :  { %v3328_v52 = vrot.slane %v3327_v39, 1  ;;  %v3338_v16 = vrot.slane %v3337_v33, 4  ;;  %v3400_v30 = vsel %vm3389_vm15, %v3322_v60, %v3399_v62 }
 0x2fa   :  { %v3333_v34 = vrot.slane %v3332_v56, 2 }
 0x2fb   :  { %v3329_v35 = vmax.f32 %v3327_v39, %v3328_v52  ;;  %v3339_v9 = vmax.f32 %v3337_v33, %v3338_v16 }
 0x2fc   :  { %v3334_v20 = vmax.f32 %v3332_v56, %v3333_v34 }
 0x2fd   :  { %v3340_v4 = vrot.slane %v3339_v9, 2  ;;  %v3401_v53 = vsel %vm3391_vm9, %v3329_v35, %v3400_v30 }
 0x2fe   :  { %v3335_v32 = vrot.slane %v3334_v20, 1 }
 0x2ff   :  { %v3341_v51 = vmax.f32 %v3339_v9, %v3340_v4 }
 0x300   :  { %v3336_v42 = vmax.f32 %v3334_v20, %v3335_v32 }
 0x301   :  { %v3342_v6 = vrot.slane %v3341_v51, 1 }
 0x302   :  { %v3402_v43 = vsel %vm3393_vm3, %v3336_v42, %v3401_v53 }
 0x303   :  { %v3343_v8 = vmax.f32 %v3341_v51, %v3342_v6 }
 0x305   :  { %v3403_v3 = vsel %vm3395_vm0, %v3343_v8, %v3402_v43 }
 0x306   :  { %4338 = vmatmul.mubr.f32.vlgmr.msra.gmra.mrb[32].mxu0 %v3403_v3 }
 0x3d9   :  { %v4339_v28 = vpop.f32.mrb[32].mxu0 }
 0x3da   :  { %v3478_v14 = vadd.f32 %v4339_v28, %v3716_v15  ;;  %v3472_v2 = vpop.f32.mrb[33].mxu0 }
 0x3db   :  { %v3473_v5 = vadd.f32 %v3716_v15, %v3472_v2 }
 0x3dc   :  { %3482 = vst [vmem:[#allocation2 + $0x8] sm:$0xff] %v3478_v14 }
 0x3dd   :  { %3481 = vst [vmem:[#allocation2] sm:$0xff] %v3473_v5 }
 0x3de   :  { %4581 = shalt.err (!%p4578_p4)
}
 0x3df   :  { %s4582_s6 = scalar_lea.hbm %s6212_s7, 256 }
 0x3e0   :  { %p4583_p5 = scmp.ne.s32.totalorder %s6212_s7, %s4582_s6  ;;  %p4586_p6 = scmp.lt.u32.totalorder %s4582_s6, %s6212_s7 }
 0x3e2   :  { %p4588_p7 = pnand %p4586_p6, %p4583_p5 }
 0x3e4   :  { %4591 = shalt.err (!%p4588_p7)
}
 0x3e5   :  { %s4596_s17 = smov 128   ;;  %s4597_s18 = smov 8  }
 0x3e6   :  { %3494 = dma.vmem_to_hbm [thread:$0]  %s3489_s10, 256, %s6212_s7, [#allocation3], %s4596_s17, %s4596_s17, %s4597_s18  }
 0x3e7   :  { %4592 = dma.done.wait [#allocation3], 256  }
 0x3e8   :  { %4593 = vsyncadd [#allocation3], 4294967040 }
 0x3e9   :  { %3498 = vsyncpa [#allocation3], 1 }

</bundles_post_ra>
